<compile_context>
chip_gen: v7x
topology: tpu7x:2x2x1
jax: 0.10.0
libtpu: 0.0.40
codegen_flags: <defaults>
</compile_context>

<pallas_src>
import jax
import jax.numpy as jnp
from jax import lax
from jax.experimental import pallas as pl
from jax.experimental.pallas import tpu as pltpu

# Model dims (small, consistent with the module's config fields)
SEQ = 8           # sequence length of dxdy
BATCH = 16        # number of agents / batch size in the demo
B_TILE = 8        # batch rows per grid step (sublane-aligned)
IN_DIM = 2        # in_features of spatial_embedding (dx, dy)
EMB = 16          # embedding_dim
HID = 32          # encoder_h_dim_d
MLP = 64          # mlp_dim
GATES = 4 * HID   # 128 -> one full vreg lane width / one MXU tile
LANES = 128
W_ROWS = EMB + 2 * HID   # w_ih (16) + w_hh (32) + w1 (32, lane-padded) = 80 rows
NEG_SLOPE = 0.01  # nn.LeakyReLU default negative_slope


def encoder_prediction_kernel(dxdy_ref, h0_ref, c0_ref, w_ref, b_ref, out_ref):
    # ---- static sub-views of the two packed parameter slabs (no extra DMAs) ----
    w_ih = w_ref[0:EMB, :]                       # (EMB, 4H)
    w_hh = w_ref[EMB:EMB + HID, :]               # (HID, 4H)
    w1 = w_ref[EMB + HID:EMB + 2 * HID, :]       # (HID, 128); lanes >= MLP are zero
    b_lstm = b_ref[0:1, :]                       # (1, 4H)   (b_ih + b_hh folded)
    w_e0 = b_ref[1:2, 0:EMB]                     # (1, EMB)  spatial_embedding row for dx
    w_e1 = b_ref[2:3, 0:EMB]                     # (1, EMB)  spatial_embedding row for dy
    b_emb = b_ref[3:4, 0:EMB]                    # (1, EMB)
    b1 = b_ref[4:5, :]                           # (1, 128); lanes >= MLP are zero
    w2_row = b_ref[5:6, :]                       # (1, 128); classifier w2 laid out along lanes
    b2 = b_ref[6:7, 0:1]                         # (1, 1)

    # ---- spatial_embedding(dxdy).tanh(): K=2 contraction done on the VPU ----
    dx = dxdy_ref[:, 0:SEQ]                      # (B, SEQ)
    dy = dxdy_ref[:, SEQ:2 * SEQ]                # (B, SEQ)
    embs = []
    for t in range(SEQ):
        e_t = jnp.tanh(dx[:, t:t + 1] * w_e0 + dy[:, t:t + 1] * w_e1 + b_emb)  # (B, EMB)
        embs.append(e_t)
    emb_all = jnp.concatenate(embs, axis=0)      # (SEQ*B, EMB), time-major

    # Input contribution to all LSTM gates in one MXU matmul (off the serial critical path).
    xg = jnp.dot(emb_all, w_ih, preferred_element_type=jnp.float32) + b_lstm   # (SEQ*B, 4H)

    # Lane mask selecting the "g" gate lanes [2H, 3H) for tanh; all other lanes use sigmoid.
    lane = lax.broadcasted_iota(jnp.int32, (B_TILE, GATES), 1)
    g_mask = (lane >= 2 * HID) & (lane < 3 * HID)

    # ---- serial LSTM recurrence (statically unrolled, SEQ steps) ----
    # TODO(synk): holding w_hh resident in the MXU staging registers
    # (pltpu.matmul_push_rhs / matmul_acc_lhs / matmul_pop) would avoid re-pushing the RHS
    # every step; kept as jnp.dot for robustness.
    h = h0_ref[...]                              # (B, HID)
    c = c0_ref[...]                              # (B, HID)
    for t in range(SEQ):
        gates = xg[t * B_TILE:(t + 1) * B_TILE, :] + jnp.dot(
            h, w_hh, preferred_element_type=jnp.float32)                       # (B, 4H)
        act = jnp.where(g_mask, jnp.tanh(gates), jax.nn.sigmoid(gates))        # full-vreg EUP
        i = act[:, 0:HID]
        f = act[:, HID:2 * HID]
        g = act[:, 2 * HID:3 * HID]
        o = act[:, 3 * HID:4 * HID]
        c = f * c + i * g
        h = o * jnp.tanh(c)

    # ---- real_classifier: Linear(HID, MLP) -> LeakyReLU -> Dropout(eval) -> Linear(MLP, 1)
    # TODO(synk): training-mode dropout is omitted; inference semantics used.
    hid = jnp.dot(h, w1, preferred_element_type=jnp.float32) + b1   # (B, 128); pad lanes stay 0
    hid = jnp.where(hid > 0.0, hid, NEG_SLOPE * hid)
    score = jnp.sum(hid * w2_row, axis=-1, keepdims=True) + b2      # lane reduce (XLU) -> (B, 1)
    out_ref[...] = score


def pack_params(params):
    """Pack the 10 parameter tensors into one weight slab and one bias/scalar slab."""
    w_slab = jnp.zeros((W_ROWS, LANES), jnp.float32)
    w_slab = w_slab.at[0:EMB, :].set(params["w_ih"])
    w_slab = w_slab.at[EMB:EMB + HID, :].set(params["w_hh"])
    w_slab = w_slab.at[EMB + HID:EMB + 2 * HID, 0:MLP].set(params["w1"])

    b_slab = jnp.zeros((8, LANES), jnp.float32)
    b_slab = b_slab.at[0, :].set(params["b_lstm"][0])
    b_slab = b_slab.at[1, 0:EMB].set(params["w_emb"][0])
    b_slab = b_slab.at[2, 0:EMB].set(params["w_emb"][1])
    b_slab = b_slab.at[3, 0:EMB].set(params["b_emb"][0])
    b_slab = b_slab.at[4, 0:MLP].set(params["b1"][0])
    b_slab = b_slab.at[5, 0:MLP].set(params["w2"][:, 0])
    b_slab = b_slab.at[6, 0:1].set(params["b2"][0])
    return w_slab, b_slab


def encoder_prediction(dxdy, img_patch, state_tuple, params):
    """Forward pass mirroring EncoderPrediction.forward (returns dynamic_score)."""
    del img_patch  # unused by the reference forward
    h0, c0 = state_tuple
    seq, batch, in_dim = dxdy.shape
    assert seq == SEQ and in_dim == IN_DIM
    assert batch % B_TILE == 0

    # batch-major layout: row b = [dx_0..dx_{S-1}, dy_0..dy_{S-1}]
    dxdy_bm = jnp.transpose(dxdy, (1, 2, 0)).reshape(batch, 2 * seq)
    w_slab, b_slab = pack_params(params)

    # advisory cost hint: tiny custom call, don't serialize the surrounding graph around it
    flops_per_row = (SEQ * EMB * 6
                     + SEQ * EMB * GATES * 2
                     + SEQ * HID * GATES * 2
                     + SEQ * GATES * 8
                     + HID * LANES * 2 + LANES * 3)
    trans_per_row = SEQ * (EMB + 2 * GATES + HID)
    bytes_acc = (W_ROWS * LANES + 8 * LANES) * 4 + batch * (2 * SEQ + 2 * HID + 1) * 4
    cost = pl.CostEstimate(flops=int(batch * flops_per_row),
                           transcendentals=int(batch * trans_per_row),
                           bytes_accessed=int(bytes_acc))

    out = pl.pallas_call(
        encoder_prediction_kernel,
        out_shape=jax.ShapeDtypeStruct((batch, 1), jnp.float32),
        grid=(batch // B_TILE,),
        in_specs=[
            pl.BlockSpec((B_TILE, 2 * SEQ), lambda b: (b, 0)),   # dxdy (batch-major)
            pl.BlockSpec((B_TILE, HID), lambda b: (b, 0)),       # h0
            pl.BlockSpec((B_TILE, HID), lambda b: (b, 0)),       # c0
            pl.BlockSpec((W_ROWS, LANES), lambda b: (0, 0)),     # packed weight slab
            pl.BlockSpec((8, LANES), lambda b: (0, 0)),          # packed bias/scalar slab
        ],
        out_specs=pl.BlockSpec((B_TILE, 1), lambda b: (b, 0)),
        compiler_params=pltpu.CompilerParams(dimension_semantics=("parallel",)),
        cost_estimate=cost,
    )(dxdy_bm, h0[0], c0[0], w_slab, b_slab)

    # Linear classifier is applied to h_n of shape (num_layers=1, batch, HID) -> (1, batch, 1)
    return out.reshape(1, batch, 1)


def encoder_prediction_ref(dxdy, state_tuple, params):
    """Pure-JAX reference of the same forward (for a numerical sanity check)."""
    h = state_tuple[0][0]
    c = state_tuple[1][0]
    emb = jnp.tanh(jnp.dot(dxdy, params["w_emb"]) + params["b_emb"])     # (S, B, EMB)
    for t in range(dxdy.shape[0]):
        gates = (jnp.dot(emb[t], params["w_ih"]) + jnp.dot(h, params["w_hh"])
                 + params["b_lstm"])
        i = jax.nn.sigmoid(gates[:, 0:HID])
        f = jax.nn.sigmoid(gates[:, HID:2 * HID])
        g = jnp.tanh(gates[:, 2 * HID:3 * HID])
        o = jax.nn.sigmoid(gates[:, 3 * HID:4 * HID])
        c = f * c + i * g
        h = o * jnp.tanh(c)
    hid = jnp.dot(h, params["w1"]) + params["b1"]
    hid = jnp.where(hid > 0, hid, NEG_SLOPE * hid)
    score = jnp.dot(hid, params["w2"]) + params["b2"]
    return score.reshape(1, -1, 1)


def init_params(key):
    """Deterministic synthetic parameters, PyTorch-style uniform(-1/sqrt(fan), 1/sqrt(fan))."""
    ks = jax.random.split(key, 10)

    def u(k, shape, fan):
        bound = 1.0 / (fan ** 0.5)
        return jax.random.uniform(k, shape, jnp.float32, -bound, bound)

    return {
        # spatial_embedding: nn.Linear(2, EMB), stored transposed (fan_in, fan_out)
        "w_emb": u(ks[0], (IN_DIM, EMB), IN_DIM),
        "b_emb": u(ks[1], (1, EMB), IN_DIM),
        # LSTM(EMB, HID): weight_ih_l0 (4H, EMB) -> (EMB, 4H); weight_hh_l0 (4H, HID) -> (HID, 4H)
        "w_ih": u(ks[2], (EMB, GATES), HID),
        "w_hh": u(ks[3], (HID, GATES), HID),
        # PyTorch has separate b_ih_l0 and b_hh_l0; fold their sum (forward-equivalent)
        "b_lstm": u(ks[4], (1, GATES), HID) + u(ks[5], (1, GATES), HID),
        # real_classifier: Linear(HID, MLP), Linear(MLP, 1)
        "w1": u(ks[6], (HID, MLP), HID),
        "b1": u(ks[7], (1, MLP), HID),
        "w2": u(ks[8], (MLP, 1), MLP),
        "b2": u(ks[9], (1, 1), MLP),
    }


if __name__ == "__main__":
    key = jax.random.PRNGKey(0)
    k_data, k_param = jax.random.split(key)

    params = init_params(k_param)

    dxdy = jax.random.normal(jax.random.fold_in(k_data, 0), (SEQ, BATCH, IN_DIM), jnp.float32)
    # img_patch is part of the forward signature but unused by the reference module
    img_patch = jax.random.normal(jax.random.fold_in(k_data, 1), (BATCH, 3, 32, 32), jnp.float32)
    h0 = jnp.zeros((1, BATCH, HID), jnp.float32)   # init_hidden semantics
    c0 = jnp.zeros((1, BATCH, HID), jnp.float32)

    dynamic_score = encoder_prediction(dxdy, img_patch, (h0, c0), params)
    jax.block_until_ready(dynamic_score)
    assert dynamic_score.shape == (1, BATCH, 1)
    assert bool(jnp.all(jnp.isfinite(dynamic_score)))

    # numerical sanity check against a pure-JAX reference (loose tol: MXU matmul precision)
    with jax.default_matmul_precision("highest"):
        ref = encoder_prediction_ref(dxdy, (h0, c0), params)
    max_err = float(jnp.max(jnp.abs(dynamic_score - ref)))
    assert max_err < 1e-2, f"kernel/reference mismatch: max abs err {max_err}"

    print("KERNEL_OK")
</pallas_src>

<mosaic_0001>
module attributes {stable_mosaic.version = 11 : i64} {
  func.func @encoder_prediction_kernel(%arg0: i32, %arg1: memref<8x16xf32, #tpu.memory_space<vmem>>, %arg2: memref<8x32xf32, #tpu.memory_space<vmem>>, %arg3: memref<8x32xf32, #tpu.memory_space<vmem>>, %arg4: memref<80x128xf32, #tpu.memory_space<vmem>>, %arg5: memref<8x128xf32, #tpu.memory_space<vmem>>, %arg6: memref<8x1xf32, #tpu.memory_space<vmem>>) attributes {dimension_semantics = [#tpu.dimension_semantics<parallel>], iteration_bounds = array<i64: 2>, scalar_prefetch = 0 : i64, scratch_operands = 0 : i64, tpu.core_type = #tpu.core_type<tc>, window_params = [{transform_indices = @transform_0, window_bounds = array<i64: 8, 16>}, {transform_indices = @transform_1, window_bounds = array<i64: 8, 32>}, {transform_indices = @transform_2, window_bounds = array<i64: 8, 32>}, {pipeline_mode = #tpu.pipeline_mode<synchronous>, transform_indices = @transform_3, window_bounds = array<i64: 80, 128>}, {pipeline_mode = #tpu.pipeline_mode<synchronous>, transform_indices = @transform_4, window_bounds = array<i64: 8, 128>}, {transform_indices = @transform_5, window_bounds = array<i64: 8, 1>}]} {
    %c0 = arith.constant 0 : index
    %c0_0 = arith.constant 0 : index
    %0 = vector.load %arg4[%c0, %c0_0] : memref<80x128xf32, #tpu.memory_space<vmem>>, vector<16x128xf32>
    %c16 = arith.constant 16 : index
    %c0_1 = arith.constant 0 : index
    %1 = vector.load %arg4[%c16, %c0_1] : memref<80x128xf32, #tpu.memory_space<vmem>>, vector<32x128xf32>
    %c48 = arith.constant 48 : index
    %c0_2 = arith.constant 0 : index
    %2 = vector.load %arg4[%c48, %c0_2] : memref<80x128xf32, #tpu.memory_space<vmem>>, vector<32x128xf32>
    %c0_3 = arith.constant 0 : index
    %c0_4 = arith.constant 0 : index
    %3 = vector.load %arg5[%c0_3, %c0_4] : memref<8x128xf32, #tpu.memory_space<vmem>>, vector<1x128xf32>
    %c1 = arith.constant 1 : index
    %c0_5 = arith.constant 0 : index
    %4 = vector.load %arg5[%c1, %c0_5] : memref<8x128xf32, #tpu.memory_space<vmem>>, vector<1x16xf32>
    %c2 = arith.constant 2 : index
    %c0_6 = arith.constant 0 : index
    %5 = vector.load %arg5[%c2, %c0_6] : memref<8x128xf32, #tpu.memory_space<vmem>>, vector<1x16xf32>
    %c3 = arith.constant 3 : index
    %c0_7 = arith.constant 0 : index
    %6 = vector.load %arg5[%c3, %c0_7] : memref<8x128xf32, #tpu.memory_space<vmem>>, vector<1x16xf32>
    %c4 = arith.constant 4 : index
    %c0_8 = arith.constant 0 : index
    %7 = vector.load %arg5[%c4, %c0_8] : memref<8x128xf32, #tpu.memory_space<vmem>>, vector<1x128xf32>
    %c5 = arith.constant 5 : index
    %c0_9 = arith.constant 0 : index
    %8 = vector.load %arg5[%c5, %c0_9] : memref<8x128xf32, #tpu.memory_space<vmem>>, vector<1x128xf32>
    %c6 = arith.constant 6 : index
    %c0_10 = arith.constant 0 : index
    %9 = vector.load %arg5[%c6, %c0_10] : memref<8x128xf32, #tpu.memory_space<vmem>>, vector<1x1xf32>
    %c0_11 = arith.constant 0 : index
    %c0_12 = arith.constant 0 : index
    %10 = vector.load %arg1[%c0_11, %c0_12] : memref<8x16xf32, #tpu.memory_space<vmem>>, vector<8x8xf32>
    %c0_13 = arith.constant 0 : index
    %c8 = arith.constant 8 : index
    %11 = vector.load %arg1[%c0_13, %c8] : memref<8x16xf32, #tpu.memory_space<vmem>>, vector<8x8xf32>
    %12 = vector.extract_strided_slice %10 {offsets = [0, 0], sizes = [8, 1], strides = [1, 1]} : vector<8x8xf32> to vector<8x1xf32>
    %13 = vector.broadcast %12 : vector<8x1xf32> to vector<8x16xf32>
    %14 = vector.broadcast %4 : vector<1x16xf32> to vector<8x16xf32>
    %15 = arith.mulf %13, %14 : vector<8x16xf32>
    %16 = vector.extract_strided_slice %11 {offsets = [0, 0], sizes = [8, 1], strides = [1, 1]} : vector<8x8xf32> to vector<8x1xf32>
    %17 = vector.broadcast %16 : vector<8x1xf32> to vector<8x16xf32>
    %18 = vector.broadcast %5 : vector<1x16xf32> to vector<8x16xf32>
    %19 = arith.mulf %17, %18 : vector<8x16xf32>
    %20 = arith.addf %15, %19 : vector<8x16xf32>
    %21 = vector.broadcast %6 : vector<1x16xf32> to vector<8x16xf32>
    %22 = arith.addf %20, %21 : vector<8x16xf32>
    %23 = math.tanh %22 : vector<8x16xf32>
    %24 = vector.extract_strided_slice %10 {offsets = [0, 1], sizes = [8, 1], strides = [1, 1]} : vector<8x8xf32> to vector<8x1xf32>
    %25 = vector.broadcast %24 : vector<8x1xf32> to vector<8x16xf32>
    %26 = vector.broadcast %4 : vector<1x16xf32> to vector<8x16xf32>
    %27 = arith.mulf %25, %26 : vector<8x16xf32>
    %28 = vector.extract_strided_slice %11 {offsets = [0, 1], sizes = [8, 1], strides = [1, 1]} : vector<8x8xf32> to vector<8x1xf32>
    %29 = vector.broadcast %28 : vector<8x1xf32> to vector<8x16xf32>
    %30 = vector.broadcast %5 : vector<1x16xf32> to vector<8x16xf32>
    %31 = arith.mulf %29, %30 : vector<8x16xf32>
    %32 = arith.addf %27, %31 : vector<8x16xf32>
    %33 = vector.broadcast %6 : vector<1x16xf32> to vector<8x16xf32>
    %34 = arith.addf %32, %33 : vector<8x16xf32>
    %35 = math.tanh %34 : vector<8x16xf32>
    %36 = vector.extract_strided_slice %10 {offsets = [0, 2], sizes = [8, 1], strides = [1, 1]} : vector<8x8xf32> to vector<8x1xf32>
    %37 = vector.broadcast %36 : vector<8x1xf32> to vector<8x16xf32>
    %38 = vector.broadcast %4 : vector<1x16xf32> to vector<8x16xf32>
    %39 = arith.mulf %37, %38 : vector<8x16xf32>
    %40 = vector.extract_strided_slice %11 {offsets = [0, 2], sizes = [8, 1], strides = [1, 1]} : vector<8x8xf32> to vector<8x1xf32>
    %41 = vector.broadcast %40 : vector<8x1xf32> to vector<8x16xf32>
    %42 = vector.broadcast %5 : vector<1x16xf32> to vector<8x16xf32>
    %43 = arith.mulf %41, %42 : vector<8x16xf32>
    %44 = arith.addf %39, %43 : vector<8x16xf32>
    %45 = vector.broadcast %6 : vector<1x16xf32> to vector<8x16xf32>
    %46 = arith.addf %44, %45 : vector<8x16xf32>
    %47 = math.tanh %46 : vector<8x16xf32>
    %48 = vector.extract_strided_slice %10 {offsets = [0, 3], sizes = [8, 1], strides = [1, 1]} : vector<8x8xf32> to vector<8x1xf32>
    %49 = vector.broadcast %48 : vector<8x1xf32> to vector<8x16xf32>
    %50 = vector.broadcast %4 : vector<1x16xf32> to vector<8x16xf32>
    %51 = arith.mulf %49, %50 : vector<8x16xf32>
    %52 = vector.extract_strided_slice %11 {offsets = [0, 3], sizes = [8, 1], strides = [1, 1]} : vector<8x8xf32> to vector<8x1xf32>
    %53 = vector.broadcast %52 : vector<8x1xf32> to vector<8x16xf32>
    %54 = vector.broadcast %5 : vector<1x16xf32> to vector<8x16xf32>
    %55 = arith.mulf %53, %54 : vector<8x16xf32>
    %56 = arith.addf %51, %55 : vector<8x16xf32>
    %57 = vector.broadcast %6 : vector<1x16xf32> to vector<8x16xf32>
    %58 = arith.addf %56, %57 : vector<8x16xf32>
    %59 = math.tanh %58 : vector<8x16xf32>
    %60 = vector.extract_strided_slice %10 {offsets = [0, 4], sizes = [8, 1], strides = [1, 1]} : vector<8x8xf32> to vector<8x1xf32>
    %61 = vector.broadcast %60 : vector<8x1xf32> to vector<8x16xf32>
    %62 = vector.broadcast %4 : vector<1x16xf32> to vector<8x16xf32>
    %63 = arith.mulf %61, %62 : vector<8x16xf32>
    %64 = vector.extract_strided_slice %11 {offsets = [0, 4], sizes = [8, 1], strides = [1, 1]} : vector<8x8xf32> to vector<8x1xf32>
    %65 = vector.broadcast %64 : vector<8x1xf32> to vector<8x16xf32>
    %66 = vector.broadcast %5 : vector<1x16xf32> to vector<8x16xf32>
    %67 = arith.mulf %65, %66 : vector<8x16xf32>
    %68 = arith.addf %63, %67 : vector<8x16xf32>
    %69 = vector.broadcast %6 : vector<1x16xf32> to vector<8x16xf32>
    %70 = arith.addf %68, %69 : vector<8x16xf32>
    %71 = math.tanh %70 : vector<8x16xf32>
    %72 = vector.extract_strided_slice %10 {offsets = [0, 5], sizes = [8, 1], strides = [1, 1]} : vector<8x8xf32> to vector<8x1xf32>
    %73 = vector.broadcast %72 : vector<8x1xf32> to vector<8x16xf32>
    %74 = vector.broadcast %4 : vector<1x16xf32> to vector<8x16xf32>
    %75 = arith.mulf %73, %74 : vector<8x16xf32>
    %76 = vector.extract_strided_slice %11 {offsets = [0, 5], sizes = [8, 1], strides = [1, 1]} : vector<8x8xf32> to vector<8x1xf32>
    %77 = vector.broadcast %76 : vector<8x1xf32> to vector<8x16xf32>
    %78 = vector.broadcast %5 : vector<1x16xf32> to vector<8x16xf32>
    %79 = arith.mulf %77, %78 : vector<8x16xf32>
    %80 = arith.addf %75, %79 : vector<8x16xf32>
    %81 = vector.broadcast %6 : vector<1x16xf32> to vector<8x16xf32>
    %82 = arith.addf %80, %81 : vector<8x16xf32>
    %83 = math.tanh %82 : vector<8x16xf32>
    %84 = vector.extract_strided_slice %10 {offsets = [0, 6], sizes = [8, 1], strides = [1, 1]} : vector<8x8xf32> to vector<8x1xf32>
    %85 = vector.broadcast %84 : vector<8x1xf32> to vector<8x16xf32>
    %86 = vector.broadcast %4 : vector<1x16xf32> to vector<8x16xf32>
    %87 = arith.mulf %85, %86 : vector<8x16xf32>
    %88 = vector.extract_strided_slice %11 {offsets = [0, 6], sizes = [8, 1], strides = [1, 1]} : vector<8x8xf32> to vector<8x1xf32>
    %89 = vector.broadcast %88 : vector<8x1xf32> to vector<8x16xf32>
    %90 = vector.broadcast %5 : vector<1x16xf32> to vector<8x16xf32>
    %91 = arith.mulf %89, %90 : vector<8x16xf32>
    %92 = arith.addf %87, %91 : vector<8x16xf32>
    %93 = vector.broadcast %6 : vector<1x16xf32> to vector<8x16xf32>
    %94 = arith.addf %92, %93 : vector<8x16xf32>
    %95 = math.tanh %94 : vector<8x16xf32>
    %96 = vector.extract_strided_slice %10 {offsets = [0, 7], sizes = [8, 1], strides = [1, 1]} : vector<8x8xf32> to vector<8x1xf32>
    %97 = vector.broadcast %96 : vector<8x1xf32> to vector<8x16xf32>
    %98 = vector.broadcast %4 : vector<1x16xf32> to vector<8x16xf32>
    %99 = arith.mulf %97, %98 : vector<8x16xf32>
    %100 = vector.extract_strided_slice %11 {offsets = [0, 7], sizes = [8, 1], strides = [1, 1]} : vector<8x8xf32> to vector<8x1xf32>
    %101 = vector.broadcast %100 : vector<8x1xf32> to vector<8x16xf32>
    %102 = vector.broadcast %5 : vector<1x16xf32> to vector<8x16xf32>
    %103 = arith.mulf %101, %102 : vector<8x16xf32>
    %104 = arith.addf %99, %103 : vector<8x16xf32>
    %105 = vector.broadcast %6 : vector<1x16xf32> to vector<8x16xf32>
    %106 = arith.addf %104, %105 : vector<8x16xf32>
    %107 = math.tanh %106 : vector<8x16xf32>
    %108 = tpu.concatenate %23, %35, %47, %59, %71, %83, %95, %107 in 0 : vector<8x16xf32>, vector<8x16xf32>, vector<8x16xf32>, vector<8x16xf32>, vector<8x16xf32>, vector<8x16xf32>, vector<8x16xf32>, vector<8x16xf32> -> vector<64x16xf32>
    %cst = arith.constant dense<0.000000e+00> : vector<64x128xf32>
    %109 = tpu.matmul %108, %0, %cst {dimension_numbers = #tpu.dot_dimension_numbers<[1], [0], [0], [1], [0, 0, 1, 1], [], []>} : vector<64x16xf32>, vector<16x128xf32>, vector<64x128xf32> -> vector<64x128xf32>
    %110 = vector.broadcast %3 : vector<1x128xf32> to vector<64x128xf32>
    %111 = arith.addf %109, %110 : vector<64x128xf32>
    %112 = tpu.iota {dimensions = array<i32: 1>} : vector<8x128xi32>
    %c64_i32 = arith.constant 64 : i32
    %113 = vector.broadcast %c64_i32 : i32 to vector<8x128xi32>
    %114 = arith.cmpi sge, %112, %113 : vector<8x128xi32>
    %c96_i32 = arith.constant 96 : i32
    %115 = vector.broadcast %c96_i32 : i32 to vector<8x128xi32>
    %116 = arith.cmpi slt, %112, %115 : vector<8x128xi32>
    %117 = arith.andi %114, %116 : vector<8x128xi1>
    %c0_14 = arith.constant 0 : index
    %c0_15 = arith.constant 0 : index
    %118 = vector.load %arg2[%c0_14, %c0_15] : memref<8x32xf32, #tpu.memory_space<vmem>>, vector<8x32xf32>
    %c0_16 = arith.constant 0 : index
    %c0_17 = arith.constant 0 : index
    %119 = vector.load %arg3[%c0_16, %c0_17] : memref<8x32xf32, #tpu.memory_space<vmem>>, vector<8x32xf32>
    %120 = vector.extract_strided_slice %111 {offsets = [0, 0], sizes = [8, 128], strides = [1, 1]} : vector<64x128xf32> to vector<8x128xf32>
    %cst_18 = arith.constant dense<0.000000e+00> : vector<8x128xf32>
    %121 = tpu.matmul %118, %1, %cst_18 {dimension_numbers = #tpu.dot_dimension_numbers<[1], [0], [0], [1], [0, 0, 1, 1], [], []>} : vector<8x32xf32>, vector<32x128xf32>, vector<8x128xf32> -> vector<8x128xf32>
    %122 = arith.addf %120, %121 : vector<8x128xf32>
    %123 = math.tanh %122 : vector<8x128xf32>
    %124 = arith.negf %122 : vector<8x128xf32>
    %125 = math.exp %124 : vector<8x128xf32>
    %cst_19 = arith.constant 1.000000e+00 : f32
    %126 = vector.broadcast %cst_19 : f32 to vector<8x128xf32>
    %127 = arith.addf %126, %125 : vector<8x128xf32>
    %128 = arith.divf %126, %127 : vector<8x128xf32>
    %129 = arith.select %117, %123, %128 : vector<8x128xi1>, vector<8x128xf32>
    %130 = vector.extract_strided_slice %129 {offsets = [0, 0], sizes = [8, 32], strides = [1, 1]} : vector<8x128xf32> to vector<8x32xf32>
    %131 = vector.extract_strided_slice %129 {offsets = [0, 32], sizes = [8, 32], strides = [1, 1]} : vector<8x128xf32> to vector<8x32xf32>
    %132 = vector.extract_strided_slice %129 {offsets = [0, 64], sizes = [8, 32], strides = [1, 1]} : vector<8x128xf32> to vector<8x32xf32>
    %133 = vector.extract_strided_slice %129 {offsets = [0, 96], sizes = [8, 32], strides = [1, 1]} : vector<8x128xf32> to vector<8x32xf32>
    %134 = arith.mulf %131, %119 : vector<8x32xf32>
    %135 = arith.mulf %130, %132 : vector<8x32xf32>
    %136 = arith.addf %134, %135 : vector<8x32xf32>
    %137 = math.tanh %136 : vector<8x32xf32>
    %138 = arith.mulf %133, %137 : vector<8x32xf32>
    %139 = vector.extract_strided_slice %111 {offsets = [8, 0], sizes = [8, 128], strides = [1, 1]} : vector<64x128xf32> to vector<8x128xf32>
    %cst_20 = arith.constant dense<0.000000e+00> : vector<8x128xf32>
    %140 = tpu.matmul %138, %1, %cst_20 {dimension_numbers = #tpu.dot_dimension_numbers<[1], [0], [0], [1], [0, 0, 1, 1], [], []>} : vector<8x32xf32>, vector<32x128xf32>, vector<8x128xf32> -> vector<8x128xf32>
    %141 = arith.addf %139, %140 : vector<8x128xf32>
    %142 = math.tanh %141 : vector<8x128xf32>
    %143 = arith.negf %141 : vector<8x128xf32>
    %144 = math.exp %143 : vector<8x128xf32>
    %cst_21 = arith.constant 1.000000e+00 : f32
    %145 = vector.broadcast %cst_21 : f32 to vector<8x128xf32>
    %146 = arith.addf %145, %144 : vector<8x128xf32>
    %147 = arith.divf %145, %146 : vector<8x128xf32>
    %148 = arith.select %117, %142, %147 : vector<8x128xi1>, vector<8x128xf32>
    %149 = vector.extract_strided_slice %148 {offsets = [0, 0], sizes = [8, 32], strides = [1, 1]} : vector<8x128xf32> to vector<8x32xf32>
    %150 = vector.extract_strided_slice %148 {offsets = [0, 32], sizes = [8, 32], strides = [1, 1]} : vector<8x128xf32> to vector<8x32xf32>
    %151 = vector.extract_strided_slice %148 {offsets = [0, 64], sizes = [8, 32], strides = [1, 1]} : vector<8x128xf32> to vector<8x32xf32>
    %152 = vector.extract_strided_slice %148 {offsets = [0, 96], sizes = [8, 32], strides = [1, 1]} : vector<8x128xf32> to vector<8x32xf32>
    %153 = arith.mulf %150, %136 : vector<8x32xf32>
    %154 = arith.mulf %149, %151 : vector<8x32xf32>
    %155 = arith.addf %153, %154 : vector<8x32xf32>
    %156 = math.tanh %155 : vector<8x32xf32>
    %157 = arith.mulf %152, %156 : vector<8x32xf32>
    %158 = vector.extract_strided_slice %111 {offsets = [16, 0], sizes = [8, 128], strides = [1, 1]} : vector<64x128xf32> to vector<8x128xf32>
    %cst_22 = arith.constant dense<0.000000e+00> : vector<8x128xf32>
    %159 = tpu.matmul %157, %1, %cst_22 {dimension_numbers = #tpu.dot_dimension_numbers<[1], [0], [0], [1], [0, 0, 1, 1], [], []>} : vector<8x32xf32>, vector<32x128xf32>, vector<8x128xf32> -> vector<8x128xf32>
    %160 = arith.addf %158, %159 : vector<8x128xf32>
    %161 = math.tanh %160 : vector<8x128xf32>
    %162 = arith.negf %160 : vector<8x128xf32>
    %163 = math.exp %162 : vector<8x128xf32>
    %cst_23 = arith.constant 1.000000e+00 : f32
    %164 = vector.broadcast %cst_23 : f32 to vector<8x128xf32>
    %165 = arith.addf %164, %163 : vector<8x128xf32>
    %166 = arith.divf %164, %165 : vector<8x128xf32>
    %167 = arith.select %117, %161, %166 : vector<8x128xi1>, vector<8x128xf32>
    %168 = vector.extract_strided_slice %167 {offsets = [0, 0], sizes = [8, 32], strides = [1, 1]} : vector<8x128xf32> to vector<8x32xf32>
    %169 = vector.extract_strided_slice %167 {offsets = [0, 32], sizes = [8, 32], strides = [1, 1]} : vector<8x128xf32> to vector<8x32xf32>
    %170 = vector.extract_strided_slice %167 {offsets = [0, 64], sizes = [8, 32], strides = [1, 1]} : vector<8x128xf32> to vector<8x32xf32>
    %171 = vector.extract_strided_slice %167 {offsets = [0, 96], sizes = [8, 32], strides = [1, 1]} : vector<8x128xf32> to vector<8x32xf32>
    %172 = arith.mulf %169, %155 : vector<8x32xf32>
    %173 = arith.mulf %168, %170 : vector<8x32xf32>
    %174 = arith.addf %172, %173 : vector<8x32xf32>
    %175 = math.tanh %174 : vector<8x32xf32>
    %176 = arith.mulf %171, %175 : vector<8x32xf32>
    %177 = vector.extract_strided_slice %111 {offsets = [24, 0], sizes = [8, 128], strides = [1, 1]} : vector<64x128xf32> to vector<8x128xf32>
    %cst_24 = arith.constant dense<0.000000e+00> : vector<8x128xf32>
    %178 = tpu.matmul %176, %1, %cst_24 {dimension_numbers = #tpu.dot_dimension_numbers<[1], [0], [0], [1], [0, 0, 1, 1], [], []>} : vector<8x32xf32>, vector<32x128xf32>, vector<8x128xf32> -> vector<8x128xf32>
    %179 = arith.addf %177, %178 : vector<8x128xf32>
    %180 = math.tanh %179 : vector<8x128xf32>
    %181 = arith.negf %179 : vector<8x128xf32>
    %182 = math.exp %181 : vector<8x128xf32>
    %cst_25 = arith.constant 1.000000e+00 : f32
    %183 = vector.broadcast %cst_25 : f32 to vector<8x128xf32>
    %184 = arith.addf %183, %182 : vector<8x128xf32>
    %185 = arith.divf %183, %184 : vector<8x128xf32>
    %186 = arith.select %117, %180, %185 : vector<8x128xi1>, vector<8x128xf32>
    %187 = vector.extract_strided_slice %186 {offsets = [0, 0], sizes = [8, 32], strides = [1, 1]} : vector<8x128xf32> to vector<8x32xf32>
    %188 = vector.extract_strided_slice %186 {offsets = [0, 32], sizes = [8, 32], strides = [1, 1]} : vector<8x128xf32> to vector<8x32xf32>
    %189 = vector.extract_strided_slice %186 {offsets = [0, 64], sizes = [8, 32], strides = [1, 1]} : vector<8x128xf32> to vector<8x32xf32>
    %190 = vector.extract_strided_slice %186 {offsets = [0, 96], sizes = [8, 32], strides = [1, 1]} : vector<8x128xf32> to vector<8x32xf32>
    %191 = arith.mulf %188, %174 : vector<8x32xf32>
    %192 = arith.mulf %187, %189 : vector<8x32xf32>
    %193 = arith.addf %191, %192 : vector<8x32xf32>
    %194 = math.tanh %193 : vector<8x32xf32>
    %195 = arith.mulf %190, %194 : vector<8x32xf32>
    %196 = vector.extract_strided_slice %111 {offsets = [32, 0], sizes = [8, 128], strides = [1, 1]} : vector<64x128xf32> to vector<8x128xf32>
    %cst_26 = arith.constant dense<0.000000e+00> : vector<8x128xf32>
    %197 = tpu.matmul %195, %1, %cst_26 {dimension_numbers = #tpu.dot_dimension_numbers<[1], [0], [0], [1], [0, 0, 1, 1], [], []>} : vector<8x32xf32>, vector<32x128xf32>, vector<8x128xf32> -> vector<8x128xf32>
    %198 = arith.addf %196, %197 : vector<8x128xf32>
    %199 = math.tanh %198 : vector<8x128xf32>
    %200 = arith.negf %198 : vector<8x128xf32>
    %201 = math.exp %200 : vector<8x128xf32>
    %cst_27 = arith.constant 1.000000e+00 : f32
    %202 = vector.broadcast %cst_27 : f32 to vector<8x128xf32>
    %203 = arith.addf %202, %201 : vector<8x128xf32>
    %204 = arith.divf %202, %203 : vector<8x128xf32>
    %205 = arith.select %117, %199, %204 : vector<8x128xi1>, vector<8x128xf32>
    %206 = vector.extract_strided_slice %205 {offsets = [0, 0], sizes = [8, 32], strides = [1, 1]} : vector<8x128xf32> to vector<8x32xf32>
    %207 = vector.extract_strided_slice %205 {offsets = [0, 32], sizes = [8, 32], strides = [1, 1]} : vector<8x128xf32> to vector<8x32xf32>
    %208 = vector.extract_strided_slice %205 {offsets = [0, 64], sizes = [8, 32], strides = [1, 1]} : vector<8x128xf32> to vector<8x32xf32>
    %209 = vector.extract_strided_slice %205 {offsets = [0, 96], sizes = [8, 32], strides = [1, 1]} : vector<8x128xf32> to vector<8x32xf32>
    %210 = arith.mulf %207, %193 : vector<8x32xf32>
    %211 = arith.mulf %206, %208 : vector<8x32xf32>
    %212 = arith.addf %210, %211 : vector<8x32xf32>
    %213 = math.tanh %212 : vector<8x32xf32>
    %214 = arith.mulf %209, %213 : vector<8x32xf32>
    %215 = vector.extract_strided_slice %111 {offsets = [40, 0], sizes = [8, 128], strides = [1, 1]} : vector<64x128xf32> to vector<8x128xf32>
    %cst_28 = arith.constant dense<0.000000e+00> : vector<8x128xf32>
    %216 = tpu.matmul %214, %1, %cst_28 {dimension_numbers = #tpu.dot_dimension_numbers<[1], [0], [0], [1], [0, 0, 1, 1], [], []>} : vector<8x32xf32>, vector<32x128xf32>, vector<8x128xf32> -> vector<8x128xf32>
    %217 = arith.addf %215, %216 : vector<8x128xf32>
    %218 = math.tanh %217 : vector<8x128xf32>
    %219 = arith.negf %217 : vector<8x128xf32>
    %220 = math.exp %219 : vector<8x128xf32>
    %cst_29 = arith.constant 1.000000e+00 : f32
    %221 = vector.broadcast %cst_29 : f32 to vector<8x128xf32>
    %222 = arith.addf %221, %220 : vector<8x128xf32>
    %223 = arith.divf %221, %222 : vector<8x128xf32>
    %224 = arith.select %117, %218, %223 : vector<8x128xi1>, vector<8x128xf32>
    %225 = vector.extract_strided_slice %224 {offsets = [0, 0], sizes = [8, 32], strides = [1, 1]} : vector<8x128xf32> to vector<8x32xf32>
    %226 = vector.extract_strided_slice %224 {offsets = [0, 32], sizes = [8, 32], strides = [1, 1]} : vector<8x128xf32> to vector<8x32xf32>
    %227 = vector.extract_strided_slice %224 {offsets = [0, 64], sizes = [8, 32], strides = [1, 1]} : vector<8x128xf32> to vector<8x32xf32>
    %228 = vector.extract_strided_slice %224 {offsets = [0, 96], sizes = [8, 32], strides = [1, 1]} : vector<8x128xf32> to vector<8x32xf32>
    %229 = arith.mulf %226, %212 : vector<8x32xf32>
    %230 = arith.mulf %225, %227 : vector<8x32xf32>
    %231 = arith.addf %229, %230 : vector<8x32xf32>
    %232 = math.tanh %231 : vector<8x32xf32>
    %233 = arith.mulf %228, %232 : vector<8x32xf32>
    %234 = vector.extract_strided_slice %111 {offsets = [48, 0], sizes = [8, 128], strides = [1, 1]} : vector<64x128xf32> to vector<8x128xf32>
    %cst_30 = arith.constant dense<0.000000e+00> : vector<8x128xf32>
    %235 = tpu.matmul %233, %1, %cst_30 {dimension_numbers = #tpu.dot_dimension_numbers<[1], [0], [0], [1], [0, 0, 1, 1], [], []>} : vector<8x32xf32>, vector<32x128xf32>, vector<8x128xf32> -> vector<8x128xf32>
    %236 = arith.addf %234, %235 : vector<8x128xf32>
    %237 = math.tanh %236 : vector<8x128xf32>
    %238 = arith.negf %236 : vector<8x128xf32>
    %239 = math.exp %238 : vector<8x128xf32>
    %cst_31 = arith.constant 1.000000e+00 : f32
    %240 = vector.broadcast %cst_31 : f32 to vector<8x128xf32>
    %241 = arith.addf %240, %239 : vector<8x128xf32>
    %242 = arith.divf %240, %241 : vector<8x128xf32>
    %243 = arith.select %117, %237, %242 : vector<8x128xi1>, vector<8x128xf32>
    %244 = vector.extract_strided_slice %243 {offsets = [0, 0], sizes = [8, 32], strides = [1, 1]} : vector<8x128xf32> to vector<8x32xf32>
    %245 = vector.extract_strided_slice %243 {offsets = [0, 32], sizes = [8, 32], strides = [1, 1]} : vector<8x128xf32> to vector<8x32xf32>
    %246 = vector.extract_strided_slice %243 {offsets = [0, 64], sizes = [8, 32], strides = [1, 1]} : vector<8x128xf32> to vector<8x32xf32>
    %247 = vector.extract_strided_slice %243 {offsets = [0, 96], sizes = [8, 32], strides = [1, 1]} : vector<8x128xf32> to vector<8x32xf32>
    %248 = arith.mulf %245, %231 : vector<8x32xf32>
    %249 = arith.mulf %244, %246 : vector<8x32xf32>
    %250 = arith.addf %248, %249 : vector<8x32xf32>
    %251 = math.tanh %250 : vector<8x32xf32>
    %252 = arith.mulf %247, %251 : vector<8x32xf32>
    %253 = vector.extract_strided_slice %111 {offsets = [56, 0], sizes = [8, 128], strides = [1, 1]} : vector<64x128xf32> to vector<8x128xf32>
    %cst_32 = arith.constant dense<0.000000e+00> : vector<8x128xf32>
    %254 = tpu.matmul %252, %1, %cst_32 {dimension_numbers = #tpu.dot_dimension_numbers<[1], [0], [0], [1], [0, 0, 1, 1], [], []>} : vector<8x32xf32>, vector<32x128xf32>, vector<8x128xf32> -> vector<8x128xf32>
    %255 = arith.addf %253, %254 : vector<8x128xf32>
    %256 = math.tanh %255 : vector<8x128xf32>
    %257 = arith.negf %255 : vector<8x128xf32>
    %258 = math.exp %257 : vector<8x128xf32>
    %cst_33 = arith.constant 1.000000e+00 : f32
    %259 = vector.broadcast %cst_33 : f32 to vector<8x128xf32>
    %260 = arith.addf %259, %258 : vector<8x128xf32>
    %261 = arith.divf %259, %260 : vector<8x128xf32>
    %262 = arith.select %117, %256, %261 : vector<8x128xi1>, vector<8x128xf32>
    %263 = vector.extract_strided_slice %262 {offsets = [0, 0], sizes = [8, 32], strides = [1, 1]} : vector<8x128xf32> to vector<8x32xf32>
    %264 = vector.extract_strided_slice %262 {offsets = [0, 32], sizes = [8, 32], strides = [1, 1]} : vector<8x128xf32> to vector<8x32xf32>
    %265 = vector.extract_strided_slice %262 {offsets = [0, 64], sizes = [8, 32], strides = [1, 1]} : vector<8x128xf32> to vector<8x32xf32>
    %266 = vector.extract_strided_slice %262 {offsets = [0, 96], sizes = [8, 32], strides = [1, 1]} : vector<8x128xf32> to vector<8x32xf32>
    %267 = arith.mulf %264, %250 : vector<8x32xf32>
    %268 = arith.mulf %263, %265 : vector<8x32xf32>
    %269 = arith.addf %267, %268 : vector<8x32xf32>
    %270 = math.tanh %269 : vector<8x32xf32>
    %271 = arith.mulf %266, %270 : vector<8x32xf32>
    %cst_34 = arith.constant dense<0.000000e+00> : vector<8x128xf32>
    %272 = tpu.matmul %271, %2, %cst_34 {dimension_numbers = #tpu.dot_dimension_numbers<[1], [0], [0], [1], [0, 0, 1, 1], [], []>} : vector<8x32xf32>, vector<32x128xf32>, vector<8x128xf32> -> vector<8x128xf32>
    %273 = vector.broadcast %7 : vector<1x128xf32> to vector<8x128xf32>
    %274 = arith.addf %272, %273 : vector<8x128xf32>
    %cst_35 = arith.constant 0.000000e+00 : f32
    %275 = vector.broadcast %cst_35 : f32 to vector<8x128xf32>
    %276 = arith.cmpf ogt, %274, %275 : vector<8x128xf32>
    %cst_36 = arith.constant 0.00999999977 : f32
    %277 = vector.broadcast %cst_36 : f32 to vector<8x128xf32>
    %278 = arith.mulf %277, %274 : vector<8x128xf32>
    %279 = arith.select %276, %274, %278 : vector<8x128xi1>, vector<8x128xf32>
    %280 = vector.broadcast %8 : vector<1x128xf32> to vector<8x128xf32>
    %281 = arith.mulf %279, %280 : vector<8x128xf32>
    %cst_37 = arith.constant dense<0.000000e+00> : vector<8xf32>
    %282 = vector.multi_reduction <add>, %281, %cst_37 [1] : vector<8x128xf32> to vector<8xf32>
    %283 = vector.shape_cast %282 : vector<8xf32> to vector<8x1xf32>
    %284 = vector.broadcast %9 : vector<1x1xf32> to vector<8x1xf32>
    %285 = arith.addf %283, %284 : vector<8x1xf32>
    %c0_38 = arith.constant 0 : index
    %c0_39 = arith.constant 0 : index
    %286 = vector.load %arg6[%c0_38, %c0_39] : memref<8x1xf32, #tpu.memory_space<vmem>>, vector<8x1xf32>
    tpu.vector_store %arg6[%c0_38, %c0_39], %285 {strides = array<i32>} : memref<8x1xf32, #tpu.memory_space<vmem>>, vector<8x1xf32>,
    return
  }
  func.func @transform_0(%arg0: i32) -> (i32, i32) {
    %c0_i32 = arith.constant 0 : i32
    %c0_i32_0 = arith.constant 0 : i32
    return %arg0, %c0_i32 : i32, i32
  }
  func.func @transform_1(%arg0: i32) -> (i32, i32) {
    %c0_i32 = arith.constant 0 : i32
    %c0_i32_0 = arith.constant 0 : i32
    return %arg0, %c0_i32 : i32, i32
  }
  func.func @transform_2(%arg0: i32) -> (i32, i32) {
    %c0_i32 = arith.constant 0 : i32
    %c0_i32_0 = arith.constant 0 : i32
    return %arg0, %c0_i32 : i32, i32
  }
  func.func @transform_3(%arg0: i32) -> (i32, i32) {
    %c0_i32 = arith.constant 0 : i32
    %c0_i32_0 = arith.constant 0 : i32
    %c0_i32_1 = arith.constant 0 : i32
    return %c0_i32, %c0_i32_0 : i32, i32
  }
  func.func @transform_4(%arg0: i32) -> (i32, i32) {
    %c0_i32 = arith.constant 0 : i32
    %c0_i32_0 = arith.constant 0 : i32
    %c0_i32_1 = arith.constant 0 : i32
    return %c0_i32, %c0_i32_0 : i32, i32
  }
  func.func @transform_5(%arg0: i32) -> (i32, i32) {
    %c0_i32 = arith.constant 0 : i32
    %c0_i32_0 = arith.constant 0 : i32
    return %arg0, %c0_i32 : i32, i32
  }
}

</mosaic_0001>

<bundles_post_ra>
// kernel: tpu_custom_call.1
= control target key start
LH: loop header
LB: loop body
LE: loop exit
PB: predicated region body
PF: predicated region fallthrough
CT: control target
= control target key end

     0   :  { %s2759_s0 = inlined_call_operand.hbm [shape: f32[16,16], index: 0, kind: input, shape index: {}]   ;;  %s2760_s1 = inlined_call_operand.hbm [shape: f32[16,32], index: 1, kind: input, shape index: {}]   ;;  %s2761_s2 = inlined_call_operand.hbm [shape: f32[16,32], index: 2, kind: input, shape index: {}]   ;;  %s2762_s3 = inlined_call_operand.hbm [shape: f32[80,128], index: 3, kind: input, shape index: {}]   ;;  %s2763_s4 = inlined_call_operand.vmem [shape: f32[8,128], index: 4, kind: input, shape index: {}]   ;;  %s2764_s5 = inlined_call_operand.vmem [shape: f32[16,1], index: 5, kind: output, shape index: {}]  }
   0x1   :  { %2774 = sst [smem:[#allocation14_spill]] %s2760_s1 }
   0x2   :  { %10 = vsyncpa [#allocation3], 0 }
   0x3   :  { %12 = vsyncpa [#allocation3 + $0x1], 0 }
   0x4   :  { %13 = vsyncpa [#allocation5], 0 }
   0x5   :  { %15 = vsyncpa [#allocation5 + $0x1], 0 }
   0x6   :  { %16 = vsyncpa [#allocation8], 0  ;;  %s2304_s18 = smov 0   ;;  %s2306_s19 = smov 0  }
   0x7   :  { %s2308_s20 = smov 0   ;;  %s2310_s21 = smov 0  }
   0x8 LB: > { %s2325_s22 = sadd.s32 1, %s2245_s21   ;;  %s29_s23 = sadd.s32 1, %s2241_s20  ;;  %s2245_s21 = sphi %s2310_s21, %s2792_s21   ;;  %s2241_s20 = sphi %s2308_s20, %s2796_s20   ;;  %s2237_s19 = sphi %s2306_s19, %s2795_s19   ;;  %s2233_s18 = sphi %s2304_s18, %s2794_s18  }
   0x9   : > { %2775 = sst [smem:[#allocation12_spill]] %s2325_s22  ;;  %s26_s24 = ssub.s32 %s2245_s21, %s2325_s22 }
   0xa   : > { %p36_p0 = scmp.ne.s32.totalorder %s2241_s20, %s2237_s19  ;;  %p27_p1 = scmp.eq.s32.totalorder %s26_s24, 0 }
   0xb   : > { %p37_p2 = scmp.eq.s32.totalorder %s2245_s21, 0  ;;  %p1930_p3 = scmp.lt.s32.totalorder %s2245_s21, 2 }
   0xc   : > { %s2335_s25 = scalar_select %p27_p1, %s2241_s20, %s29_s23  }
   0xd   : > { %p38_p4 = por %p37_p2, %p36_p0  ;;  %s202_s26 = sand.u32 1, %s2241_s20  }
   0xe   : > { %2776 = sst [smem:[#allocation13_spill]] %s2335_s25  ;;  %s2340_s27 = sshll.u32 %s202_s26, 3 }
   0xf   : > { %s2343_s28 = sshll.u32 %s2245_s21, 7  ;;  %p2345_p5 = pnand %p1930_p3, %p38_p4 }
  0x10   : > { %s220_s30 = sand.u32 1, %s2245_s21   ;;  %s2778_s1 = sld [smem:[#allocation14_spill]] }
  0x11   : > { %s2777_s29 = scalar_select %p2345_p5, 1, 0 }
  0x12   : > { %s224_s9 = scalar_lea.vmem [#allocation4], %s2340_s27  ;;  %s2359_s11 = scalar_lea.sflag [#allocation5], %s220_s30 }
  0x13   : > { %s231_s10 = sshll.u32 %s224_s9, 4  ;;  %p2365_p7 = pneg %p2345_p5  ;;  %s2357_s10 = int_to_ptr.vmem [resolvable:$true] %s231_s10 }
  0x15   : > { %s2779_s13 = scalar_select %p2365_p7, 1, 0 }
  0x16   : > { %s2354_s8 = scalar_lea.hbm %s2778_s1, %s2343_s28  ;;  %s2090_s16 = scalar_lea.hbm %s2778_s1, 256 }
  0x17   : > { %s2085_s12 = scalar_lea.hbm %s2354_s8, 128  ;;  %p2091_p10 = scmp.lt.u32.totalorder %s2354_s8, %s2778_s1 }
  0x18   : > { %p2086_p6 = scmp.ne.s32.totalorder %s2354_s8, %s2085_s12  ;;  %p2092_p11 = scmp.lt.u32.totalorder %s2090_s16, %s2085_s12 }
  0x19   : > { %p2094_p13 = scmp.lt.u32.totalorder %s2085_s12, %s2354_s8 }
  0x1a   : > { %p2088_p8 = pnand %p2365_p7, %p2086_p6  ;;  %p2093_p12 = por %p2092_p11, %p2091_p10 }
  0x1c   : > { %p2089_p9 = pneg %p2088_p8  ;;  %p2095_p0 = por %p2094_p13, %p2093_p12 }
  0x1e   : > { %p2096_p1 = pnand %p2095_p0, %p2089_p9 }
  0x20   : > { %2099 = shalt.err (!%p2096_p1)
}
  0x21   : > { %s2100_s24 = scalar_lea.vmem %s2357_s10, 128  ;;  %s2247_s30 = smov [#allocation4]  }
  0x22   : > { %p2101_p2 = scmp.ne.s32.totalorder %s2357_s10, %s2100_s24  ;;  %s2105_s6 = sshll.u32 %s2247_s30, 4  ;;  %s2106_s6 = int_to_ptr.vmem [resolvable:$false] %s2105_s6 }
  0x23   : > { %s2107_s7 = scalar_lea.vmem %s2106_s6, 256  ;;  %p2108_p6 = scmp.lt.s32.totalorder %s2357_s10, %s2106_s6 }
  0x24   : > { %p2103_p3 = pnand %p2101_p2, %p2365_p7  ;;  %p2109_p8 = scmp.lt.s32.totalorder %s2107_s7, %s2100_s24 }
  0x26   : > { %p2104_p4 = pneg %p2103_p3  ;;  %p2110_p10 = por %p2109_p8, %p2108_p6 }
  0x28   : > { %p2111_p11 = pnand %p2110_p10, %p2104_p4 }
  0x2a   : > { %2114 = shalt.err (!%p2111_p11)
}
  0x2b   : > { %1925 = dma.hbm_to_vmem [thread:$0]  (!%p2345_p5), %s2354_s8, 128, %s2357_s10, %s2359_s11  }
  0x2c   : > { %s2390_s9 = sadd.s32 4294967295, %s2245_s21   ;;  %p42_p9 = scmp.ne.s32.totalorder %s2237_s19, %s2233_s18 }
  0x2d   : > { %p2765_p12 = scmp.eq.s32.totalorder %s2390_s9, 0  ;;  %p1628_p13 = scmp.ge.s32.totalorder %s2245_s21, 1 }
  0x2e   : > { %p173_p0 = scmp.lt.s32.totalorder %s2245_s21, 3  ;;  %s2248_s8 = smov [#allocation7]  }
  0x2f   : > { %p2399_p1 = por %p2765_p12, %p42_p9  ;;  %s185_s10 = sshll.u32 %s2248_s8, 4  ;;  %s2407_s10 = int_to_ptr.vmem [resolvable:$true] %s185_s10 }
  0x30   : > { %p2403_p2 = pnand %p1628_p13, %p173_p0  ;;  %s2421_s16 = scalar_lea.hbm %s2759_s0, %s2343_s28 }
  0x31   : > { %s2780_s12 = scalar_select %p2399_p1, 1, 0 }
  0x32   : > { %s2781_s14 = scalar_select %p2403_p2, 1, 0 }
  0x33   : > { %p1915_p3 = pneg %p2403_p2  ;;  %s206_s17 = scalar_lea.vmem [#allocation2], %s2340_s27 }
  0x34   : > { %s213_s23 = sshll.u32 %s206_s17, 4  ;;  %s2115_s6 = scalar_lea.hbm %s2762_s3, 1280  ;;  %s2424_s23 = int_to_ptr.vmem [resolvable:$true] %s213_s23 }
  0x35   : > { %p2413_p4 = pnand %p1915_p3, %p2765_p12  ;;  %p2116_p6 = scmp.ne.s32.totalorder %s2762_s3, %s2115_s6 }
  0x36   : > { %p2122_p9 = scmp.lt.u32.totalorder %s2115_s6, %s2762_s3 }
  0x37   : > { %p2117_p8 = pneg %p2413_p4 }
  0x39   : > { %p2118_p10 = pnand %p2117_p8, %p2116_p6 }
  0x3b   : > { %p2119_p11 = pneg %p2118_p10 }
  0x3d   : > { %p2124_p13 = pnand %p2122_p9, %p2119_p11 }
  0x3f   : > { %2127 = shalt.err (!%p2124_p13)
}
  0x40   : > { %s2128_s17 = scalar_lea.vmem %s2407_s10, 1280  ;;  %p2136_p1 = scmp.lt.s32.totalorder %s2407_s10, %s2407_s10 }
  0x41   : > { %p2129_p0 = scmp.ne.s32.totalorder %s2407_s10, %s2128_s17  ;;  %p2137_p2 = scmp.lt.s32.totalorder %s2128_s17, %s2128_s17 }
  0x43   : > { %p2131_p3 = pnand %p2129_p0, %p2117_p8  ;;  %p2138_p5 = por %p2137_p2, %p2136_p1 }
  0x45   : > { %p2132_p12 = pneg %p2131_p3 }
  0x47   : > { %p2139_p7 = pnand %p2138_p5, %p2132_p12 }
  0x49   : > { %2142 = shalt.err (!%p2139_p7)
}
  0x4a   : > { %s2249_s24 = smov 128   ;;  %s2250_s30 = smov 8  }
  0x4b   : > { %1918 = dma.hbm_to_vmem [thread:$0]  (!%p2413_p4), %s2762_s3, 1280, %s2407_s10, [#allocation8], %s2249_s24, %s2249_s24, %s2250_s30  }
  0x4c   : > { %s203_s8 = scalar_lea.sflag [#allocation3], %s202_s26  ;;  %s2143_s21 = scalar_lea.hbm %s2421_s16, 128 }
  0x4d   : > { %p2144_p5 = scmp.ne.s32.totalorder %s2421_s16, %s2143_s21  ;;  %p2783_p7 = scmp.ne.s32.totalorder %s2779_s13, 0 }
  0x4e   : > { %s2148_s1 = scalar_lea.hbm %s2759_s0, 256  ;;  %p2149_p2 = scmp.lt.u32.totalorder %s2421_s16, %s2759_s0 }
  0x4f   : > { %p2146_p12 = pnand %p2144_p5, %p2783_p7  ;;  %p2150_p6 = scmp.lt.u32.totalorder %s2148_s1, %s2143_s21 }
  0x50   : > { %p2152_p10 = scmp.lt.u32.totalorder %s2143_s21, %s2421_s16 }
  0x51   : > { %p2147_p1 = pneg %p2146_p12  ;;  %p2151_p8 = por %p2150_p6, %p2149_p2 }
  0x53   : > { %p2153_p11 = por %p2152_p10, %p2151_p8 }
  0x55   : > { %p2154_p4 = pnand %p2153_p11, %p2147_p1 }
  0x57   : > { %2157 = shalt.err (!%p2154_p4)
}
  0x58   : > { %s2158_s26 = scalar_lea.vmem %s2424_s23, 128  ;;  %s2251_s10 = smov [#allocation2]  }
  0x59   : > { %p2159_p9 = scmp.ne.s32.totalorder %s2424_s23, %s2158_s26  ;;  %s2163_s18 = sshll.u32 %s2251_s10, 4  ;;  %s2164_s18 = int_to_ptr.vmem [resolvable:$false] %s2163_s18 }
  0x5a   : > { %s2165_s22 = scalar_lea.vmem %s2164_s18, 256  ;;  %p2166_p3 = scmp.lt.s32.totalorder %s2424_s23, %s2164_s18 }
  0x5b   : > { %p2161_p13 = pnand %p2159_p9, %p2783_p7  ;;  %p2167_p5 = scmp.lt.s32.totalorder %s2165_s22, %s2158_s26 }
  0x5d   : > { %p2162_p0 = pneg %p2161_p13  ;;  %p2168_p12 = por %p2167_p5, %p2166_p3 }
  0x5f   : > { %p2169_p2 = pnand %p2168_p12, %p2162_p0 }
  0x61   : > { %2172 = shalt.err (!%p2169_p2)
}
  0x62   : > { %p2784_p1 = scmp.ne.s32.totalorder %s2777_s29, 0  ;;  %s2474_s24 = scalar_lea.hbm %s2761_s2, %s2343_s28 }
  0x63   : > { %s242_s30 = scalar_lea.vmem [#allocation6], %s2340_s27  ;;  %s2173_s7 = scalar_lea.hbm %s2474_s24, 128 }
  0x64   : > { %1922 = dma.hbm_to_vmem [thread:$0]  (!%p2784_p1), %s2421_s16, 128, %s2424_s23, %s203_s8  }
  0x65   : > { %s249_s6 = sshll.u32 %s242_s30, 4  ;;  %p2174_p6 = scmp.ne.s32.totalorder %s2474_s24, %s2173_s7  ;;  %s250_s6 = int_to_ptr.vmem [resolvable:$true] %s249_s6 }
  0x66   : > { %s2178_s16 = scalar_lea.hbm %s2761_s2, 256  ;;  %p2179_p11 = scmp.lt.u32.totalorder %s2474_s24, %s2761_s2 }
  0x67   : > { %p2176_p8 = pnand %p2174_p6, %p2783_p7  ;;  %p2180_p4 = scmp.lt.u32.totalorder %s2178_s16, %s2173_s7 }
  0x68   : > { %p2182_p13 = scmp.lt.u32.totalorder %s2173_s7, %s2474_s24 }
  0x69   : > { %p2177_p10 = pneg %p2176_p8  ;;  %p2181_p9 = por %p2180_p4, %p2179_p11 }
  0x6b   : > { %p2183_p0 = por %p2182_p13, %p2181_p9 }
  0x6d   : > { %p2184_p3 = pnand %p2183_p0, %p2177_p10 }
  0x6f   : > { %2187 = shalt.err (!%p2184_p3)
}
  0x70   : > { %s2188_s27 = scalar_lea.vmem %s250_s6, 128  ;;  %s2252_s28 = smov [#allocation6]  }
  0x71   : > { %p2189_p5 = scmp.ne.s32.totalorder %s250_s6, %s2188_s27  ;;  %s2193_s17 = sshll.u32 %s2252_s28, 4  ;;  %s2194_s17 = int_to_ptr.vmem [resolvable:$false] %s2193_s17 }
  0x72   : > { %s2195_s26 = scalar_lea.vmem %s2194_s17, 256  ;;  %p2196_p6 = scmp.lt.s32.totalorder %s250_s6, %s2194_s17 }
  0x73   : > { %p2191_p12 = pnand %p2189_p5, %p2783_p7  ;;  %p2197_p8 = scmp.lt.s32.totalorder %s2195_s26, %s2188_s27 }
  0x75   : > { %p2192_p2 = pneg %p2191_p12  ;;  %p2198_p1 = por %p2197_p8, %p2196_p6 }
  0x77   : > { %p2199_p4 = pnand %p2198_p1, %p2192_p2 }
  0x79   : > { %2202 = shalt.err (!%p2199_p4)
}
  0x7a   : > { %p2785_p11 = scmp.ne.s32.totalorder %s2777_s29, 0  ;;  %p2786_p10 = scmp.ne.s32.totalorder %s2781_s14, 0 }
  0x7b   : > { %s260_s13 = sand.u32 (!%p2786_p10), 1, %s2237_s19   ;;  %p2787_p7 = scmp.ne.s32.totalorder (!%p2786_p10), %s2780_s12, 0 }
  0x7c   : > { %1928 = dma.hbm_to_vmem [thread:$0]  (!%p2785_p11), %s2474_s24, 128, %s250_s6, %s2359_s11  }
  0x7d   : > { %258 = sbr.rel (%p2786_p10) target bundleno = 6404 (0x1904), region = 40  ;;  %s2498_s10 = sshll.u32 (!%p2786_p10), %s260_s13, 3 }
  0x7e   : > { %s261_s18 = scalar_lea.sflag (!%p2786_p10), [#allocation3], %s260_s13  ;;  %s264_s22 = scalar_lea.vmem (!%p2786_p10), [#allocation2], %s2498_s10 }
  0x84   : > { %2220 = dma.done.wait (%p2787_p7), %s261_s18, 128  }
  0x85   : > { %2222 = vsyncadd (%p2787_p7), %s261_s18, 4294967168  ;;  %s269_s29 = sand.u32 1, %s2390_s9   ;;  %s273_s14 = scalar_lea.vmem [#allocation4], %s2498_s10 }
  0x86   : > { %s270_s11 = scalar_lea.sflag [#allocation5], %s269_s29 }
  0x87   : > { %2224 = dma.done.wait (%p2787_p7), %s270_s11, 256  }
  0x88   : > { %2226 = vsyncadd (%p2787_p7), %s270_s11, 4294967040  ;;  %s282_s1 = scalar_lea.vmem [#allocation6], %s2498_s10  ;;  %p2788_p1 = scmp.eq.s32.totalorder %s2390_s9, 0 }
  0x8a   : > { %2228 = dma.done.wait (%p2788_p1), [#allocation8], 1280   ;;  %p2789_p9 = pmov %p2788_p1 }
  0x8b   : > { %v2253_v0 = vmov 1   ;;  %v2254_v1 = vmov 0   ;;  %v2516_v2 = vld [vmem:[%s264_s22] sm:$0xff]  ;;  %v2255_v3 = vmov 9   ;;  %v2256_v4 = vmov 8   ;;  %v326_v7 = vld [vmem:[#allocation7] sm:$0xff] }
  0x8c   : > { %2230 = vsyncadd (%p2789_p9), [#allocation8], 4294966016  ;;  %1990 = vset.pattern.permute.xlu1 %v2253_v0  ;;  %1988 = vset.pattern.permute.xlu0 %v2254_v1  ;;  %v328_v5 = vld [vmem:[#allocation7 + $0x10] sm:$0xff]  ;;  %v329_v6 = vld [vmem:[#allocation7 + $0x18] sm:$0xff]  ;;  %v2257_v8 = vmov 0.0|0.0   ;;  %vm602_vm0 = vcmask 261120   ;;  %v595_v44 = vlaneseq }
  0x8d   : > { %371 = vperm.xlu1 %1990, %v2516_v2   ;;  %346 = vperm.xlu0 %1988, %v2516_v2   ;;  %v2523_v9 = vpack.c.bf16 %v329_v6, %v328_v5  ;;  %v327_v10 = vld [vmem:[#allocation7 + $0x8] sm:$0xff]  ;;  %v330_v12 = vld [vmem:[#allocation7 + $0x20] sm:$0xff]  ;;  %v601_v16 = vld [vmem:[%s282_s1] sm:$0xff]  ;;  %vm2258_vm1 = vmmov 0   ;;  %v2259_v17 = vmov 0.0   ;;  %s2260_s12 = smov 32  }
  0x8e   : > { %1851 = vmatprep.subr.bf16.mxu1 %v2257_v8  ;;  %v1847_v11 = vpack.c.bf16 %v327_v10, %v326_v7  ;;  %v331_v13 = vld [vmem:[#allocation7 + $0x28] sm:$0xff]  ;;  %1756 = vmatprep.mubr.msk.f32.mxu1 %vm2258_vm1, %v2259_v17  ;;  %v2549_v20 = vld [vmem:[%s2763_s4 + $0x1] ss:$0 sm:$0xff]  ;;  %v2554_v21 = vld [vmem:[%s2763_s4 + $0x2] ss:$0 sm:$0xff]  ;;  %vm465_vm2 = vcmask 130048  }
  0x8f   : > { %1853 = vmatpush3.bf16.msra.mxu1 %v2523_v9  ;;  %v2528_v14 = vpack.c.bf16 %v331_v13, %v330_v12  ;;  %v600_v15 = vld [vmem:[%s273_s14] sm:$0xff]  ;;  %v2563_v28 = vld [vmem:[%s2763_s4 + $0x3] ss:$0 sm:$0xff]  ;;  %v2576_v37 = vld [vmem:[%s2763_s4] ss:$0 sm:$0xff]  ;;  %v596_v46 = vand.u32 127, %v595_v44 }
  0x90   : > { %1848 = vmatprep.subr.bf16.mxu0 %v1847_v11  ;;  %1854 = vmatprep.subr.bf16.mxu1 %v2257_v8  ;;  %s2261_s23 = smov 64   ;;  %v2262_v12 = vmov 2   ;;  %v2263_v13 = vmov 10   ;;  %p322_p13 = scmp.lt.s32.totalorder %s2390_s9, 1  ;;  %vm1507_vm7 = vcmask 7168  }
  0x91   : > { %1991 = vset.pattern.permute.xlu1 %v2255_v3  ;;  %1989 = vset.pattern.permute.xlu0 %v2256_v4  ;;  %vm597_vm3 = vcmp.ge.s32.totalorder %v596_v46, 64  ;;  %vm598_vm4 = vcmp.lt.s32.totalorder %v596_v46, 96 }
  0x92   : > { %376 = vperm.xlu1 %1991, %v2516_v2   ;;  %355 = vperm.xlu0 %1989, %v2516_v2   ;;  %vm2579_vm5 = vmand %vm597_vm3, %vm598_vm4  ;;  %s2798_s9 = smov (!%p322_p13, %s2390_s9), 1 }
  0x93   : > { %1850 = vmatpush3.bf16.msra.mxu0 %v1847_v11  ;;  %1856 = vmatpush3.bf16.msra.mxu1 %v2528_v14  ;;  %s1642_s26 = sshll.u32 %s2798_s9, 3 }
  0x94   : > { %1863 = vmatprep.subr.bf16.mxu0 %v2257_v8  ;;  %1857 = vmatprep.subr.bf16.mxu1 %v2257_v8  ;;  %s325_s29 = scalar_lea.vmem %s2764_s5, %s1642_s26 }
  0x96   : > { %686 = vrot.lane.b32.xlu0 %v601_v16, %s2260_s12  ;;  %1757 = vmatmul.mubr.msk.f32.vlgmr.msra.gmra.mrb[0].mxu1 %vm602_vm0, %v600_v15  ;;  %v2264_v15 = vmov 3   ;;  %v2265_v16 = vmov 11  }
  0x97   : > { %1859 = vmatpush3.bf16.msra.mxu1 %v2523_v9  ;;  %1767 = vmatprep.mubr.msk.f32.mxu1 %vm2258_vm1, %v2259_v17 }
  0x98   : > { %1860 = vmatprep.subr.bf16.mxu1 %v2257_v8  ;;  %1992 = vset.pattern.permute.xlu1 %v2262_v12 }
  0x99   : > { %1993 = vset.pattern.permute.xlu0 %v2263_v13 }
  0x9b   : > { %1862 = vmatpush3.bf16.msra.mxu1 %v2528_v14 }
  0x9c   : > { %1869 = vmatprep.subr.bf16.mxu1 %v2257_v8 }
 0x10c   : > { %v347_v18 = vpop.permute.xlu0 %346  ;;  %v372_v19 = vpop.permute.xlu1 %371 }
 0x10d   : > { %v353_v24 = vmul.f32 %v2549_v20, %v347_v18  ;;  %v374_v25 = vmul.f32 %v2549_v20, %v372_v19  ;;  %v2266_v18 = vmov 12   ;;  %v2267_v19 = vmov 5  }
 0x111   : > { %v377_v22 = vpop.permute.xlu1 %376  ;;  %v356_v23 = vpop.permute.xlu0 %355 }
 0x112   : > { %v379_v26 = vmul.f32 %v2554_v21, %v377_v22  ;;  %v362_v27 = vmul.f32 %v2554_v21, %v356_v23  ;;  %v2268_v22 = vmov 6   ;;  %v2269_v23 = vmov 14  }
 0x114   : > { %v380_v29 = vadd.f32 %v379_v26, %v374_v25  ;;  %v363_v30 = vadd.f32 %v362_v27, %v353_v24  ;;  %v2270_v24 = vmov 15  }
 0x115   : > { %v687_v53 = vpop.permute.xlu0 %686 }
 0x116   : > { %v381_v31 = vadd.f32 %v2563_v28, %v380_v29  ;;  %v368_v32 = vadd.f32 %v2563_v28, %v363_v30  ;;  %v2271_v30 = vmov 4  }
 0x118   : > { %2005 = vtanh.f32 %v381_v31  ;;  %v2272_v31 = vmov 13  }
 0x119   : > { %2007 = vtanh.f32 %v368_v32  ;;  %v2273_v32 = vmov 7  }
 0x122   : > { %v2006_v33 = vpop.eup %2005 }
 0x123   : > { %v2008_v34 = vpop.eup %2007 }
 0x124   : > { %1736 = vmatprep.mubr.msk.f32.mxu0 %vm465_vm2, %v2008_v34 }
 0x125   : > { %1737 = vmatmul.mubr.msk.f32.vlgmr.msra.gmra.mrb[0].mxu0 %vm465_vm2, %v2006_v33 }
 0x126   : > { %1865 = vmatpush3.bf16.msra.mxu0 %v2523_v9 }
 0x127   : > { %1866 = vmatprep.subr.bf16.mxu0 %v2257_v8 }
 0x12a   : > { %1868 = vmatpush3.bf16.msra.mxu0 %v2528_v14 }
 0x12b   : > { %1875 = vmatprep.subr.bf16.mxu0 %v2257_v8 }
 0x169   : > { %v672_v35 = vpop.f32.mrb[0].mxu1 }
 0x16a   : > { %v1758_v36 = vpop.f32.mrb[1].mxu1 }
 0x1f8   : > { %v1738_v38 = vpop.f32.mrb[0].mxu0 }
 0x1f9   : > { %v556_v39 = vpop.f32.mrb[1].mxu0  ;;  %v562_v61 = vadd.f32 %v1738_v38, %v2576_v37 }
 0x1fa   : > { %v557_v40 = vadd.f32 %v2576_v37, %v556_v39 }
 0x1fc   : > { %v676_v41 = vadd.f32 %v672_v35, %v557_v40 }
 0x1fe   : > { %v1656_v42 = vmul.f32 -1.442695, %v676_v41 }
 0x200   : > { %2009 = vpow2.f32 %v1656_v42 }
 0x201   : > { %2011 = vtanh.f32 %v676_v41 }
 0x20a   : > { %v2010_v43 = vpop.eup %2009 }
 0x20b   : > { %v681_v45 = vadd.f32 1.0, %v2010_v43  ;;  %v2012_v48 = vpop.eup %2011 }
 0x20d   : > { %2013 = vrcp.f32 %v681_v45 }
 0x217   : > { %v2014_v49 = vpop.eup %2013 }
 0x218   : > { %v684_v50 = vsel %vm2579_vm5, %v2012_v48, %v2014_v49 }
 0x219   : > { %691 = vrot.lane.b32.xlu1 %v684_v50, %s2261_s23  ;;  %v689_v54 = vmul.f32 %v687_v53, %v684_v50 }
 0x28b   : > { %v692_v51 = vpop.permute.xlu1 %691 }
 0x28c   : > { %v694_v52 = vmul.f32 %v692_v51, %v684_v50 }
 0x28e   : > { %696 = vrot.lane.b32.xlu1 %v694_v52, %s2260_s12 }
 0x300   : > { %v697_v55 = vpop.permute.xlu1 %696 }
 0x301   : > { %v699_v56 = vadd.f32 %v697_v55, %v689_v54 }
 0x303   : > { %2015 = vtanh.f32 %v699_v56 }
 0x30d   : > { %v2016_v57 = vpop.eup %2015 }
 0x30e   : > { %702 = vrot.lane.b32.xlu0 %v2016_v57, %s2261_s23 }
 0x380   : > { %v703_v58 = vpop.permute.xlu0 %702 }
 0x381   : > { %v705_v59 = vmul.f32 %v703_v58, %v684_v50 }
 0x383   : > { %707 = vrot.lane.b32.xlu1 %v705_v59, %s2260_s12 }
 0x3f5   : > { %v708_v60 = vpop.permute.xlu1 %707 }
 0x3f6   : > { %1768 = vmatmul.mubr.msk.f32.vlgmr.msra.gmra.mrb[2].mxu1 %vm602_vm0, %v708_v60 }
 0x3f7   : > { %1871 = vmatpush3.bf16.msra.mxu1 %v2523_v9  ;;  %1789 = vmatprep.mubr.msk.f32.mxu1 %vm2258_vm1, %v2259_v17 }
 0x3f8   : > { %1872 = vmatprep.subr.bf16.mxu1 %v2257_v8 }
 0x3fb   : > { %1874 = vmatpush3.bf16.msra.mxu1 %v2528_v14 }
 0x3fc   : > { %1881 = vmatprep.subr.bf16.mxu1 %v2257_v8 }
 0x4c9   : > { %v777_v62 = vpop.f32.mrb[2].mxu1 }
 0x4ca   : > { %v781_v63 = vadd.f32 %v777_v62, %v562_v61  ;;  %v1769_v0 = vpop.f32.mrb[3].mxu1 }
 0x4cc   : > { %v1658_v1 = vmul.f32 -1.442695, %v781_v63 }
 0x4ce   : > { %2017 = vpow2.f32 %v1658_v1 }
 0x4cf   : > { %2019 = vtanh.f32 %v781_v63 }
 0x4d8   : > { %v2018_v3 = vpop.eup %2017 }
 0x4d9   : > { %v786_v4 = vadd.f32 1.0, %v2018_v3  ;;  %v2020_v5 = vpop.eup %2019 }
 0x4db   : > { %2021 = vrcp.f32 %v786_v4 }
 0x4e5   : > { %v2022_v6 = vpop.eup %2021 }
 0x4e6   : > { %v789_v7 = vsel %vm2579_vm5, %v2020_v5, %v2022_v6 }
 0x4e7   : > { %792 = vrot.lane.b32.xlu0 %v789_v7, %s2261_s23  ;;  %v790_v25 = vmul.f32 %v789_v7, %v699_v56 }
 0x559   : > { %v793_v10 = vpop.permute.xlu0 %792 }
 0x55a   : > { %v795_v11 = vmul.f32 %v793_v10, %v789_v7 }
 0x55c   : > { %797 = vrot.lane.b32.xlu1 %v795_v11, %s2260_s12 }
 0x560   : > { %384 = vperm.xlu1 %1992, %v2516_v2  }
 0x564   : > { %1994 = vset.pattern.permute.xlu1 %v2264_v15 }
 0x565   : > { %397 = vperm.xlu1 %1994, %v2516_v2  }
 0x569   : > { %1995 = vset.pattern.permute.xlu1 %v2265_v16 }
 0x56a   : > { %402 = vperm.xlu1 %1995, %v2516_v2  }
 0x56e   : > { %1997 = vset.pattern.permute.xlu1 %v2266_v18 }
 0x56f   : > { %415 = vperm.xlu1 %1997, %v2516_v2  }
 0x573   : > { %1998 = vset.pattern.permute.xlu1 %v2267_v19 }
 0x574   : > { %423 = vperm.xlu1 %1998, %v2516_v2  }
 0x578   : > { %2000 = vset.pattern.permute.xlu1 %v2268_v22 }
 0x579   : > { %436 = vperm.xlu1 %2000, %v2516_v2  }
 0x57d   : > { %2001 = vset.pattern.permute.xlu1 %v2269_v23 }
 0x57e   : > { %441 = vperm.xlu1 %2001, %v2516_v2  }
 0x582   : > { %2003 = vset.pattern.permute.xlu1 %v2270_v24 }
 0x583   : > { %454 = vperm.xlu1 %2003, %v2516_v2  }
 0x5ce   : > { %v798_v26 = vpop.permute.xlu1 %797 }
 0x5cf   : > { %v2609_v27 = vadd.f32 %v798_v26, %v790_v25 }
 0x5d1   : > { %2023 = vtanh.f32 %v2609_v27 }
 0x5db   : > { %v2024_v29 = vpop.eup %2023 }
 0x5dc   : > { %803 = vrot.lane.b32.xlu0 %v2024_v29, %s2261_s23 }
 0x5df   : > { %v385_v33 = vpop.permute.xlu1 %384 }
 0x5e0   : > { %389 = vperm.xlu0 %1993, %v2516_v2   ;;  %v387_v45 = vmul.f32 %v2549_v20, %v385_v33 }
 0x5e4   : > { %1996 = vset.pattern.permute.xlu0 %v2271_v30  ;;  %v398_v34 = vpop.permute.xlu1 %397 }
 0x5e5   : > { %410 = vperm.xlu0 %1996, %v2516_v2   ;;  %v400_v41 = vmul.f32 %v2549_v20, %v398_v34 }
 0x5e9   : > { %1999 = vset.pattern.permute.xlu0 %v2272_v31  ;;  %v403_v35 = vpop.permute.xlu1 %402 }
 0x5ea   : > { %428 = vperm.xlu0 %1999, %v2516_v2   ;;  %v405_v42 = vmul.f32 %v2554_v21, %v403_v35 }
 0x5ec   : > { %v406_v44 = vadd.f32 %v405_v42, %v400_v41 }
 0x5ee   : > { %2002 = vset.pattern.permute.xlu0 %v2273_v32  ;;  %v416_v38 = vpop.permute.xlu1 %415  ;;  %v407_v49 = vadd.f32 %v2563_v28, %v406_v44 }
 0x5ef   : > { %449 = vperm.xlu0 %2002, %v2516_v2   ;;  %v418_v51 = vmul.f32 %v2554_v21, %v416_v38 }
 0x5f0   : > { %2025 = vtanh.f32 %v407_v49 }
 0x5f3   : > { %2004 = vset.pattern.permute.xlu0 %v2270_v24  ;;  %v424_v40 = vpop.permute.xlu1 %423 }
 0x5f4   : > { %v426_v59 = vmul.f32 %v2549_v20, %v424_v40 }
 0x5f8   : > { %v437_v43 = vpop.permute.xlu1 %436 }
 0x5f9   : > { %v439_v52 = vmul.f32 %v2549_v20, %v437_v43 }
 0x5fa   : > { %v2026_v6 = vpop.eup %2025 }
 0x5fd   : > { %v442_v48 = vpop.permute.xlu1 %441 }
 0x5fe   : > { %v444_v53 = vmul.f32 %v2554_v21, %v442_v48 }
 0x600   : > { %v445_v58 = vadd.f32 %v444_v53, %v439_v52 }
 0x602   : > { %v455_v63 = vpop.permute.xlu1 %454  ;;  %v446_v0 = vadd.f32 %v2563_v28, %v445_v58 }
 0x603   : > { %v457_v3 = vmul.f32 %v2554_v21, %v455_v63 }
 0x64e   : > { %v804_v36 = vpop.permute.xlu0 %803 }
 0x64f   : > { %v806_v39 = vmul.f32 %v804_v36, %v789_v7 }
 0x651   : > { %808 = vrot.lane.b32.xlu1 %v806_v39, %s2260_s12 }
 0x65f   : > { %v390_v46 = vpop.permute.xlu0 %389 }
 0x660   : > { %v392_v2 = vmul.f32 %v2554_v21, %v390_v46 }
 0x662   : > { %v393_v50 = vadd.f32 %v392_v2, %v387_v45 }
 0x664   : > { %v394_v54 = vadd.f32 %v2563_v28, %v393_v50  ;;  %v411_v55 = vpop.permute.xlu0 %410 }
 0x665   : > { %v413_v56 = vmul.f32 %v2549_v20, %v411_v55 }
 0x666   : > { %2027 = vtanh.f32 %v394_v54 }
 0x667   : > { %v419_v57 = vadd.f32 %v418_v51, %v413_v56 }
 0x669   : > { %v420_v60 = vadd.f32 %v2563_v28, %v419_v57  ;;  %v429_v61 = vpop.permute.xlu0 %428 }
 0x66a   : > { %v431_v62 = vmul.f32 %v2554_v21, %v429_v61 }
 0x66b   : > { %2029 = vtanh.f32 %v420_v60 }
 0x66c   : > { %v432_v1 = vadd.f32 %v431_v62, %v426_v59  ;;  %2031 = vtanh.f32 %v446_v0 }
 0x66e   : > { %v433_v4 = vadd.f32 %v2563_v28, %v432_v1  ;;  %v450_v5 = vpop.permute.xlu0 %449 }
 0x66f   : > { %v452_v7 = vmul.f32 %v2549_v20, %v450_v5 }
 0x670   : > { %v2028_v10 = vpop.eup %2027  ;;  %2033 = vtanh.f32 %v433_v4 }
 0x671   : > { %1739 = vmatprep.mubr.msk.f32.mxu0 %vm465_vm2, %v2028_v10  ;;  %v458_v11 = vadd.f32 %v457_v3, %v452_v7 }
 0x672   : > { %1740 = vmatmul.mubr.msk.f32.gmra.mrb[2].mxu0 %vm465_vm2, %v2026_v6 }
 0x673   : > { %v459_v12 = vadd.f32 %v2563_v28, %v458_v11 }
 0x675   : > { %v2030_v13 = vpop.eup %2029  ;;  %2035 = vtanh.f32 %v459_v12 }
 0x676   : > { %1742 = vmatprep.mubr.msk.f32.mxu0 %vm465_vm2, %v2030_v13  ;;  %v2032_v21 = vpop.eup %2031 }
 0x67a   : > { %v2034_v15 = vpop.eup %2033 }
 0x67b   : > { %1743 = vmatmul.mubr.msk.f32.gmra.mrb[4].mxu0 %vm465_vm2, %v2034_v15 }
 0x67c   : > { %1745 = vmatprep.mubr.msk.f32.mxu0 %vm465_vm2, %v2032_v21 }
 0x67f   : > { %v2036_v20 = vpop.eup %2035 }
 0x680   : > { %1746 = vmatmul.mubr.msk.f32.gmra.mrb[6].mxu0 %vm465_vm2, %v2036_v20 }
 0x681   : > { %1778 = vmatprep.mubr.msk.f32.mxu0 %vm2258_vm1, %v2259_v17 }
 0x6c3   : > { %v809_v16 = vpop.permute.xlu1 %808 }
 0x6c4   : > { %1779 = vmatmul.mubr.msk.f32.vlgmr.msra.gmra.mrb[8].mxu0 %vm602_vm0, %v809_v16 }
 0x6c5   : > { %1877 = vmatpush3.bf16.msra.mxu0 %v2523_v9  ;;  %1800 = vmatprep.mubr.msk.f32.mxu0 %vm2258_vm1, %v2259_v17 }
 0x6c6   : > { %1878 = vmatprep.subr.bf16.mxu0 %v2257_v8 }
 0x6c9   : > { %1880 = vmatpush3.bf16.msra.mxu0 %v2528_v14 }
 0x6ca   : > { %1887 = vmatprep.subr.bf16.mxu0 %v2257_v8 }
 0x745   : > { %v1741_v28 = vpop.f32.mrb[2].mxu0 }
 0x746   : > { %v566_v18 = vpop.f32.mrb[3].mxu0 }
 0x747   : > { %v567_v25 = vadd.f32 %v2576_v37, %v566_v18 }
 0x74e   : > { %v2651_v19 = vpop.f32.mrb[4].mxu0 }
 0x74f   : > { %v2653_v22 = vpop.f32.mrb[5].mxu0 }
 0x750   : > { %v577_v1 = vadd.f32 %v2576_v37, %v2653_v22 }
 0x753   : > { %v2655_v23 = vpop.f32.mrb[6].mxu0 }
 0x754   : > { %v2657_v24 = vpop.f32.mrb[7].mxu0 }
 0x797   : > { %v878_v26 = vpop.f32.mrb[8].mxu0 }
 0x798   : > { %v882_v29 = vadd.f32 %v878_v26, %v567_v25  ;;  %v1780_v30 = vpop.f32.mrb[9].mxu0 }
 0x79a   : > { %v1660_v31 = vmul.f32 -1.442695, %v882_v29 }
 0x79c   : > { %2037 = vpow2.f32 %v1660_v31 }
 0x79d   : > { %2039 = vtanh.f32 %v882_v29  ;;  %v582_v29 = vadd.f32 %v2651_v19, %v2576_v37 }
 0x7a6   : > { %v2038_v32 = vpop.eup %2037 }
 0x7a7   : > { %v887_v33 = vadd.f32 1.0, %v2038_v32  ;;  %v2040_v34 = vpop.eup %2039 }
 0x7a9   : > { %2041 = vrcp.f32 %v887_v33 }
 0x7b3   : > { %v2042_v35 = vpop.eup %2041 }
 0x7b4   : > { %v890_v36 = vsel %vm2579_vm5, %v2040_v34, %v2042_v35 }
 0x7b5   : > { %893 = vrot.lane.b32.xlu0 %v890_v36, %s2261_s23  ;;  %v891_v40 = vmul.f32 %v890_v36, %v2609_v27  ;;  %v572_v27 = vadd.f32 %v1741_v28, %v2576_v37 }
 0x827   : > { %v894_v38 = vpop.permute.xlu0 %893 }
 0x828   : > { %v896_v39 = vmul.f32 %v894_v38, %v890_v36 }
 0x82a   : > { %898 = vrot.lane.b32.xlu1 %v896_v39, %s2260_s12 }
 0x89c   : > { %v899_v41 = vpop.permute.xlu1 %898 }
 0x89d   : > { %v901_v42 = vadd.f32 %v899_v41, %v891_v40 }
 0x89f   : > { %2043 = vtanh.f32 %v901_v42 }
 0x8a9   : > { %v2044_v43 = vpop.eup %2043 }
 0x8aa   : > { %904 = vrot.lane.b32.xlu0 %v2044_v43, %s2261_s23 }
 0x91c   : > { %v905_v44 = vpop.permute.xlu0 %904 }
 0x91d   : > { %v907_v45 = vmul.f32 %v905_v44, %v890_v36 }
 0x91f   : > { %909 = vrot.lane.b32.xlu1 %v907_v45, %s2260_s12 }
 0x991   : > { %v910_v46 = vpop.permute.xlu1 %909 }
 0x992   : > { %1790 = vmatmul.mubr.msk.f32.vlgmr.msra.gmra.mrb[4].mxu1 %vm602_vm0, %v910_v46  ;;  %v587_v46 = vadd.f32 %v2576_v37, %v2657_v24 }
 0x993   : > { %1883 = vmatpush3.bf16.msra.mxu1 %v2523_v9  ;;  %1811 = vmatprep.mubr.msk.f32.mxu1 %vm2258_vm1, %v2259_v17 }
 0x994   : > { %1884 = vmatprep.subr.bf16.mxu1 %v2257_v8 }
 0x997   : > { %1886 = vmatpush3.bf16.msra.mxu1 %v2528_v14 }
 0x998   : > { %1893 = vmatprep.subr.bf16.mxu1 %v2257_v8 }
 0xa65   : > { %v979_v2 = vpop.f32.mrb[4].mxu1 }
 0xa66   : > { %v983_v48 = vadd.f32 %v979_v2, %v572_v27  ;;  %v1791_v49 = vpop.f32.mrb[5].mxu1 }
 0xa68   : > { %v1662_v50 = vmul.f32 -1.442695, %v983_v48 }
 0xa6a   : > { %2045 = vpow2.f32 %v1662_v50 }
 0xa6b   : > { %2047 = vtanh.f32 %v983_v48 }
 0xa74   : > { %v2046_v51 = vpop.eup %2045 }
 0xa75   : > { %v988_v52 = vadd.f32 1.0, %v2046_v51  ;;  %v2048_v53 = vpop.eup %2047 }
 0xa77   : > { %2049 = vrcp.f32 %v988_v52 }
 0xa81   : > { %v2050_v54 = vpop.eup %2049 }
 0xa82   : > { %v991_v55 = vsel %vm2579_vm5, %v2048_v53, %v2050_v54 }
 0xa83   : > { %994 = vrot.lane.b32.xlu0 %v991_v55, %s2261_s23  ;;  %v992_v58 = vmul.f32 %v991_v55, %v901_v42 }
 0xaf5   : > { %v995_v56 = vpop.permute.xlu0 %994 }
 0xaf6   : > { %v997_v57 = vmul.f32 %v995_v56, %v991_v55 }
 0xaf8   : > { %999 = vrot.lane.b32.xlu1 %v997_v57, %s2260_s12 }
 0xb6a   : > { %v1000_v59 = vpop.permute.xlu1 %999 }
 0xb6b   : > { %v1002_v60 = vadd.f32 %v1000_v59, %v992_v58 }
 0xb6d   : > { %2051 = vtanh.f32 %v1002_v60 }
 0xb77   : > { %v2052_v61 = vpop.eup %2051 }
 0xb78   : > { %1005 = vrot.lane.b32.xlu0 %v2052_v61, %s2261_s23 }
 0xbea   : > { %v1006_v62 = vpop.permute.xlu0 %1005 }
 0xbeb   : > { %v1008_v63 = vmul.f32 %v1006_v62, %v991_v55  ;;  %v592_v62 = vadd.f32 %v2655_v23, %v2576_v37 }
 0xbed   : > { %1010 = vrot.lane.b32.xlu1 %v1008_v63, %s2260_s12 }
 0xc5f   : > { %v1011_v0 = vpop.permute.xlu1 %1010 }
 0xc60   : > { %1801 = vmatmul.mubr.msk.f32.vlgmr.msra.gmra.mrb[10].mxu0 %vm602_vm0, %v1011_v0 }
 0xc61   : > { %1889 = vmatpush3.bf16.msra.mxu0 %v2523_v9  ;;  %1822 = vmatprep.mubr.msk.f32.mxu0 %vm2258_vm1, %v2259_v17 }
 0xc62   : > { %1890 = vmatprep.subr.bf16.mxu0 %v2257_v8 }
 0xc65   : > { %1892 = vmatpush3.bf16.msra.mxu0 %v2528_v14 }
 0xc66   : > { %1899 = vmatprep.subr.bf16.mxu0 %v2257_v8 }
 0xd33   : > { %v1080_v3 = vpop.f32.mrb[10].mxu0 }
 0xd34   : > { %v1084_v4 = vadd.f32 %v1080_v3, %v577_v1  ;;  %v1802_v5 = vpop.f32.mrb[11].mxu0 }
 0xd36   : > { %v1664_v6 = vmul.f32 -1.442695, %v1084_v4 }
 0xd38   : > { %2053 = vpow2.f32 %v1664_v6 }
 0xd39   : > { %2055 = vtanh.f32 %v1084_v4 }
 0xd42   : > { %v2054_v7 = vpop.eup %2053 }
 0xd43   : > { %v1089_v10 = vadd.f32 1.0, %v2054_v7  ;;  %v2056_v11 = vpop.eup %2055 }
 0xd45   : > { %2057 = vrcp.f32 %v1089_v10 }
 0xd4f   : > { %v2058_v12 = vpop.eup %2057 }
 0xd50   : > { %v1092_v13 = vsel %vm2579_vm5, %v2056_v11, %v2058_v12 }
 0xd51   : > { %1095 = vrot.lane.b32.xlu0 %v1092_v13, %s2261_s23  ;;  %v1093_v20 = vmul.f32 %v1092_v13, %v1002_v60 }
 0xdc3   : > { %v1096_v21 = vpop.permute.xlu0 %1095 }
 0xdc4   : > { %v1098_v15 = vmul.f32 %v1096_v21, %v1092_v13  ;;  %v332_v21 = vld [vmem:[#allocation7 + $0x30] sm:$0xff] }
 0xdc6   : > { %1100 = vrot.lane.b32.xlu1 %v1098_v15, %s2260_s12  ;;  %v333_v15 = vld [vmem:[#allocation7 + $0x38] sm:$0xff] }
 0xe38   : > { %v1101_v16 = vpop.permute.xlu1 %1100 }
 0xe39   : > { %v1103_v28 = vadd.f32 %v1101_v16, %v1093_v20  ;;  %v334_v20 = vld [vmem:[#allocation7 + $0x40] sm:$0xff]  ;;  %v1900_v16 = vpack.c.bf16 %v333_v15, %v332_v21 }
 0xe3b   : > { %2059 = vtanh.f32 %v1103_v28 }
 0xe45   : > { %v2060_v18 = vpop.eup %2059 }
 0xe46   : > { %1106 = vrot.lane.b32.xlu0 %v2060_v18, %s2261_s23 }
 0xeb8   : > { %v1107_v22 = vpop.permute.xlu0 %1106 }
 0xeb9   : > { %v1109_v25 = vmul.f32 %v1107_v22, %v1092_v13 }
 0xebb   : > { %1111 = vrot.lane.b32.xlu1 %v1109_v25, %s2260_s12 }
 0xf2d   : > { %v1112_v26 = vpop.permute.xlu1 %1111 }
 0xf2e   : > { %1812 = vmatmul.mubr.msk.f32.vlgmr.msra.gmra.mrb[6].mxu1 %vm602_vm0, %v1112_v26 }
 0xf2f   : > { %1895 = vmatpush3.bf16.msra.mxu1 %v2523_v9  ;;  %1833 = vmatprep.mubr.msk.f32.mxu1 %vm2258_vm1, %v2259_v17 }
 0xf30   : > { %1896 = vmatprep.subr.bf16.mxu1 %v2257_v8 }
 0xf33   : > { %1898 = vmatpush3.bf16.msra.mxu1 %v2528_v14 }
0x1001   : > { %v1181_v30 = vpop.f32.mrb[6].mxu1 }
0x1002   : > { %v1185_v31 = vadd.f32 %v1181_v30, %v582_v29  ;;  %v1813_v32 = vpop.f32.mrb[7].mxu1  ;;  %v1671_v29 = vld [vmem:[%s2763_s4 + $0x4] ss:$0 sm:$0xff] }
0x1004   : > { %v1666_v33 = vmul.f32 -1.442695, %v1185_v31 }
0x1006   : > { %2061 = vpow2.f32 %v1666_v33  ;;  %v1673_v33 = vld [vmem:[%s2763_s4 + $0x5] ss:$0 sm:$0xff] }
0x1007   : > { %2063 = vtanh.f32 %v1185_v31 }
0x1010   : > { %v2062_v34 = vpop.eup %2061 }
0x1011   : > { %v1190_v35 = vadd.f32 1.0, %v2062_v34  ;;  %v2064_v9 = vpop.eup %2063 }
0x1013   : > { %2065 = vrcp.f32 %v1190_v35 }
0x101d   : > { %v2066_v36 = vpop.eup %2065 }
0x101e   : > { %v1193_v38 = vsel %vm2579_vm5, %v2064_v9, %v2066_v36  ;;  %v1674_v9 = vld [vmem:[%s2763_s4 + $0x6] ss:$0 sm:$0xff] }
0x101f   : > { %1196 = vrot.lane.b32.xlu0 %v1193_v38, %s2261_s23  ;;  %v1194_v19 = vmul.f32 %v1193_v38, %v1103_v28  ;;  %v335_v28 = vld [vmem:[#allocation7 + $0x48] sm:$0xff] }
0x1020   : > { %v1903_v18 = vpack.c.bf16 %v335_v28, %v334_v20 }
0x1091   : > { %v1197_v14 = vpop.permute.xlu0 %1196 }
0x1092   : > { %v1199_v39 = vmul.f32 %v1197_v14, %v1193_v38 }
0x1094   : > { %1201 = vrot.lane.b32.xlu1 %v1199_v39, %s2260_s12 }
0x1106   : > { %v1202_v40 = vpop.permute.xlu1 %1201 }
0x1107   : > { %v1204_v41 = vadd.f32 %v1202_v40, %v1194_v19 }
0x1109   : > { %2067 = vtanh.f32 %v1204_v41 }
0x1113   : > { %v2068_v42 = vpop.eup %2067 }
0x1114   : > { %1207 = vrot.lane.b32.xlu0 %v2068_v42, %s2261_s23 }
0x1186   : > { %v1208_v43 = vpop.permute.xlu0 %1207 }
0x1187   : > { %v1210_v44 = vmul.f32 %v1208_v43, %v1193_v38 }
0x1189   : > { %1212 = vrot.lane.b32.xlu1 %v1210_v44, %s2260_s12 }
0x11fb   : > { %v1213_v45 = vpop.permute.xlu1 %1212 }
0x11fc   : > { %1823 = vmatmul.mubr.msk.f32.vlgmr.msra.gmra.mrb[12].mxu0 %vm602_vm0, %v1213_v45 }
0x11fd   : > { %1844 = vmatprep.mubr.msk.f32.mxu0 %vm2258_vm1, %v2259_v17  ;;  %1901 = vmatpush3.bf16.msra.mxu0 %v1900_v16 }
0x11fe   : > { %1902 = vmatprep.subr.bf16.mxu0 %v2257_v8 }
0x1201   : > { %1904 = vmatpush3.bf16.msra.mxu0 %v1903_v18 }
0x12cf   : > { %v1282_v27 = vpop.f32.mrb[12].mxu0 }
0x12d0   : > { %v1286_v2 = vadd.f32 %v1282_v27, %v587_v46  ;;  %v1824_v48 = vpop.f32.mrb[13].mxu0 }
0x12d2   : > { %v1668_v49 = vmul.f32 -1.442695, %v1286_v2 }
0x12d4   : > { %2069 = vpow2.f32 %v1668_v49 }
0x12d5   : > { %2071 = vtanh.f32 %v1286_v2 }
0x12de   : > { %v2070_v50 = vpop.eup %2069 }
0x12df   : > { %v1291_v51 = vadd.f32 1.0, %v2070_v50  ;;  %v2072_v52 = vpop.eup %2071 }
0x12e1   : > { %2073 = vrcp.f32 %v1291_v51 }
0x12eb   : > { %v2074_v53 = vpop.eup %2073 }
0x12ec   : > { %v1294_v54 = vsel %vm2579_vm5, %v2072_v52, %v2074_v53 }
0x12ed   : > { %1297 = vrot.lane.b32.xlu0 %v1294_v54, %s2261_s23  ;;  %v1295_v24 = vmul.f32 %v1294_v54, %v1204_v41 }
0x135f   : > { %v1298_v17 = vpop.permute.xlu0 %1297 }
0x1360   : > { %v1300_v55 = vmul.f32 %v1298_v17, %v1294_v54 }
0x1362   : > { %1302 = vrot.lane.b32.xlu1 %v1300_v55, %s2260_s12 }
0x13d4   : > { %v1303_v56 = vpop.permute.xlu1 %1302 }
0x13d5   : > { %v1305_v57 = vadd.f32 %v1303_v56, %v1295_v24 }
0x13d7   : > { %2075 = vtanh.f32 %v1305_v57 }
0x13e1   : > { %v2076_v58 = vpop.eup %2075 }
0x13e2   : > { %1308 = vrot.lane.b32.xlu0 %v2076_v58, %s2261_s23 }
0x1454   : > { %v1309_v59 = vpop.permute.xlu0 %1308 }
0x1455   : > { %v1311_v60 = vmul.f32 %v1309_v59, %v1294_v54 }
0x1457   : > { %1313 = vrot.lane.b32.xlu1 %v1311_v60, %s2260_s12 }
0x14c9   : > { %v1314_v61 = vpop.permute.xlu1 %1313 }
0x14ca   : > { %1834 = vmatmul.mubr.msk.f32.vlgmr.msra.gmra.mrb[8].mxu1 %vm602_vm0, %v1314_v61 }
0x159d   : > { %v1383_v63 = vpop.f32.mrb[8].mxu1 }
0x159e   : > { %v1387_v0 = vadd.f32 %v1383_v63, %v592_v62  ;;  %v1835_v1 = vpop.f32.mrb[9].mxu1 }
0x15a0   : > { %v1670_v3 = vmul.f32 -1.442695, %v1387_v0 }
0x15a2   : > { %2077 = vpow2.f32 %v1670_v3 }
0x15a3   : > { %2079 = vtanh.f32 %v1387_v0 }
0x15ac   : > { %v2078_v4 = vpop.eup %2077 }
0x15ad   : > { %v1392_v5 = vadd.f32 1.0, %v2078_v4  ;;  %v2080_v6 = vpop.eup %2079 }
0x15af   : > { %2081 = vrcp.f32 %v1392_v5 }
0x15b9   : > { %v2082_v7 = vpop.eup %2081 }
0x15ba   : > { %v1395_v10 = vsel %vm2579_vm5, %v2080_v6, %v2082_v7 }
0x15bb   : > { %1398 = vrot.lane.b32.xlu0 %v1395_v10, %s2261_s23  ;;  %v1396_v37 = vmul.f32 %v1395_v10, %v1305_v57 }
0x162d   : > { %v1399_v11 = vpop.permute.xlu0 %1398 }
0x162e   : > { %v1401_v12 = vmul.f32 %v1399_v11, %v1395_v10 }
0x1630   : > { %1403 = vrot.lane.b32.xlu1 %v1401_v12, %s2260_s12 }
0x16a2   : > { %v1404_v23 = vpop.permute.xlu1 %1403 }
0x16a3   : > { %v1406_v13 = vadd.f32 %v1404_v23, %v1396_v37 }
0x16a5   : > { %2083 = vtanh.f32 %v1406_v13 }
0x16af   : > { %v2084_v47 = vpop.eup %2083 }
0x16b0   : > { %1409 = vrot.lane.b32.xlu0 %v2084_v47, %s2261_s23 }
0x1722   : > { %v1410_v22 = vpop.permute.xlu0 %1409 }
0x1723   : > { %v1412_v25 = vmul.f32 %v1410_v22, %v1395_v10 }
0x1725   : > { %1418 = vrot.lane.b32.xlu1 %v1412_v25, %s2260_s12 }
0x1797   : > { %v1419_v26 = vpop.permute.xlu1 %1418 }
0x1798   : > { %1845 = vmatmul.mubr.msk.f32.vlgmr.msra.gmra.mrb[14].mxu0 %vm602_vm0, %v1419_v26 }
0x186b   : > { %v1488_v30 = vpop.f32.mrb[14].mxu0 }
0x186c   : > { %v1489_v31 = vadd.f32 %v1671_v29, %v1488_v30  ;;  %v1846_v8 = vpop.f32.mrb[15].mxu0 }
0x186e   : > { %v1493_v32 = vmul.f32 0.01, %v1489_v31  ;;  %vm1492_vm6 = vcmp.gt.f32.partialorder %v1489_v31, 0.0 }
0x1870   : > { %v1494_v34 = vsel %vm1492_vm6, %v1489_v31, %v1493_v32 }
0x1871   : > { %v1499_v35 = vmul.f32 %v1673_v33, %v1494_v34 }
0x1873   : > { %1500 = vadd.xlane.f32.xlu0 %v1499_v35 }
0x1900   : > { %v1501_v36 = vpop.xlane.xlu0 %1500 }
0x1901   : > { %v1506_v38 = vadd.f32 %v1674_v9, %v1501_v36 }
0x1903   : > { %1508 = vst.msk [vmem:[%s325_s29] sm:$0xff] %vm1507_vm7, %v1506_v38 }
0x1904 PF: > { %s2792_s21 = sld [smem:[#allocation12_spill]]  ;;  %s2793_s11 = sld [smem:[#allocation13_spill]] }
0x1905   : > { %s2794_s18 = smov %s2237_s19  ;;  %s2795_s19 = smov %s2241_s20 }
0x190a   : > { %p19_p0 = scmp.ge.s32.totalorder %s2792_s21, 4   ;;  %s2796_s20 = smov %s2793_s11 }
0x190c   :  { %21 = sbr.rel (!%p19_p0) target bundleno = 8 (0x8), region = 108 }
0x1913   :  { %1528 = vsyncpa [#allocation3], 1 }
0x1914   :  { %1530 = vsyncpa [#allocation3 + $0x1], 1 }
0x1915   :  { %1531 = vsyncpa [#allocation5], 1 }
0x1916   :  { %1533 = vsyncpa [#allocation5 + $0x1], 1 }
0x1917   :  { %1534 = vsyncpa [#allocation8], 1 }

</bundles_post_ra>
